<compile_context>
chip_gen: v5e
topology: v5e:2x2
jax: 0.10.0
libtpu: 0.0.40
codegen_flags: <defaults>
</compile_context>

<pallas_src>
import jax
import jax.numpy as jnp
from jax.experimental import pallas as pl
from jax.experimental.pallas import tpu as pltpu


_VMEM_LIMIT = 32 * 1024 * 1024    # explicit scoped-VMEM limit (raises v5e's 16 MiB
                                  # default; == default on v6e/v7x, <= v7x physical)
_VMEM_BUDGET = 20 * 1024 * 1024   # per-step working-set target (headroom for the
                                  # resident weight blocks + compiler scratch)


# ---------------------------------------------------------------------------
# Kernels
# ---------------------------------------------------------------------------
def conv_pool_relu_kernel(p_ref, w_ref, b_ref, o_ref):
    """conv(k5) + maxpool(2) + relu from 6x6/stride-2 patches.

    p_ref: (bt, P, F)    patches, F = C*36, feature order (c, kh6, kw6)
    w_ref: (4, F, OC)    conv weights scattered per pooling phase
    b_ref: (1, OC)
    o_ref: (bt, P, OC)   pooled + relu'd output (position-major, channel-minor)
    """
    bt, npos, feat = p_ref.shape
    oc = b_ref.shape[1]
    lhs = p_ref[...].reshape(bt * npos, feat)
    # 4 per-phase dots + running max (2x2 maxpool == max over the 4 phases);
    # keeps the live f32 intermediate one phase wide.
    m = jnp.dot(lhs, w_ref[0], preferred_element_type=jnp.float32)
    for ph in range(1, 4):
        m = jnp.maximum(m, jnp.dot(lhs, w_ref[ph],
                                   preferred_element_type=jnp.float32))
    m = m.reshape(bt, npos, oc)
    # Per-channel bias commutes with the max; relu after the pool (as torch).
    o_ref[...] = jnp.maximum(m + b_ref[...], 0.0)


def conv2_head_kernel(p_ref, w2_ref, b2_ref, w1f_ref, b1f_ref, w2f_ref,
                      b2f_ref, o_ref):
    """Fused conv2 + maxpool + relu + flatten + fc1 + relu + fc2 + log_softmax.

    p_ref:  (bt, 16, 360)   6x6/stride-2 patches of the conv1 feature map
    w2_ref: (4, 360, 20)    phase-scattered conv2 weights
    w1f_ref:(16, 20, 50)    fc1 weights, flatten order folded in at trace time
    o_ref:  (bt, 1, 10)     log-probs
    """
    bt, npos, feat = p_ref.shape
    oc = b2_ref.shape[1]
    nh = w1f_ref.shape[2]

    lhs = p_ref[...].reshape(bt * npos, feat)
    m = jnp.dot(lhs, w2_ref[0], preferred_element_type=jnp.float32)
    for ph in range(1, 4):
        m = jnp.maximum(m, jnp.dot(lhs, w2_ref[ph],
                                   preferred_element_type=jnp.float32))
    m = m.reshape(bt, npos, oc)
    # TODO(synk): nn.Dropout2d training-mode masking not implemented (eval identity).
    h2 = jnp.maximum(m + b2_ref[...], 0.0)                      # (bt, 16, 20)

    # fc1: torch's channel-major view(-1, 320) is folded into the (16, 20, 50)
    # weight layout; 16 accumulating dots avoid a lane-merging reshape.
    acc = jnp.zeros((bt, nh), jnp.float32)
    for p in range(npos):
        acc = acc + jnp.dot(h2[:, p, :], w1f_ref[p],
                            preferred_element_type=jnp.float32)
    h3 = jnp.maximum(acc + b1f_ref[...], 0.0)                   # (bt, 50)
    # TODO(synk): F.dropout training-mode masking not implemented (eval identity).

    logits = jnp.dot(h3, w2f_ref[...],
                     preferred_element_type=jnp.float32) + b2f_ref[...]
    mx = jnp.max(logits, axis=-1, keepdims=True)
    lse = mx + jnp.log(jnp.sum(jnp.exp(logits - mx), axis=-1, keepdims=True))
    o_ref[...] = (logits - lse)[:, None, :]                     # (bt, 1, 10)


# ---------------------------------------------------------------------------
# Tiling helpers (padding-aware VMEM accounting, v7x-friendly grids)
# ---------------------------------------------------------------------------
def _tile_cap(P, F, OC, in_itemsize, budget=_VMEM_BUDGET):
    """Max images per grid step, from PADDED (8,128) VMEM footprints:
    double-buffered in/out blocks + ~4 live f32 per-phase GEMM/epilogue temps."""
    lane = lambda n: pl.cdiv(n, 128) * 128
    sub = lambda n: max(8, pl.cdiv(n, 8) * 8)
    in_img = sub(P) * lane(F) * in_itemsize
    out_img = sub(P) * lane(OC) * 4
    live_img = 4 * sub(P) * lane(OC) * 4
    return max(1, budget // (2 * in_img + 2 * out_img + live_img))


def _batch_tiles(B, cap):
    """(tile, grid steps, padded batch): >=2 steps whenever B>1 so the
    "parallel" batch axis uses both v7x TensorCores; tile <= padding-aware
    VMEM cap; batch padded to a tile multiple (no odd/prime divisor cliff)."""
    n_steps = max(2 if B > 1 else 1, pl.cdiv(B, cap))
    bt = pl.cdiv(B, n_steps)
    return bt, n_steps, bt * n_steps


# ---------------------------------------------------------------------------
# Pallas wrappers
# ---------------------------------------------------------------------------
def conv_pool_relu(p6, wph, b):
    """[B, P, C*36] stride-2 patches -> [B, P, OC] pooled+relu'd conv output."""
    B, P, F = p6.shape
    OC = b.shape[1]
    isz = p6.dtype.itemsize
    bt, n_steps, Bp = _batch_tiles(B, _tile_cap(P, F, OC, isz))
    if Bp != B:
        p6 = jnp.pad(p6, ((0, Bp - B), (0, 0), (0, 0)))
    cost = pl.CostEstimate(
        flops=2 * Bp * P * F * 4 * OC + 6 * Bp * P * OC,
        transcendentals=0,
        bytes_accessed=Bp * P * F * isz + 4 * F * OC * isz
                       + Bp * P * OC * 4 + OC * 4)
    out = pl.pallas_call(
        conv_pool_relu_kernel,
        out_shape=jax.ShapeDtypeStruct((Bp, P, OC), jnp.float32),
        grid=(n_steps,),
        in_specs=[
            pl.BlockSpec((bt, P, F), lambda i: (i, 0, 0)),
            pl.BlockSpec((4, F, OC), lambda i: (0, 0, 0)),
            pl.BlockSpec((1, OC), lambda i: (0, 0)),
        ],
        out_specs=pl.BlockSpec((bt, P, OC), lambda i: (i, 0, 0)),
        compiler_params=pltpu.CompilerParams(
            dimension_semantics=("parallel",),
            vmem_limit_bytes=_VMEM_LIMIT),
        cost_estimate=cost,
    )(p6, wph, b)
    return out if Bp == B else out[:B]


def conv2_mlp_head(p6, w2ph, b2, w1f, b1f, w2fT, b2f):
    """Fused conv2 block + MLP head: [B, 16, 360] patches -> [B, 10] log-probs."""
    B, P, F = p6.shape
    OC = b2.shape[1]
    NH = w1f.shape[2]
    NO = w2fT.shape[1]
    isz = p6.dtype.itemsize
    wsz = w2ph.dtype.itemsize
    bt, n_steps, Bp = _batch_tiles(B, _tile_cap(P, F, OC, isz))
    if Bp != B:
        p6 = jnp.pad(p6, ((0, Bp - B), (0, 0), (0, 0)))
    cost = pl.CostEstimate(
        flops=2 * Bp * (P * F * 4 * OC + P * OC * NH + NH * NO) + 8 * Bp * P * OC,
        transcendentals=Bp * (NO + 1),
        bytes_accessed=(Bp * P * F * isz + 4 * F * OC * wsz
                        + P * OC * NH * 4 + NH * NO * 4 + Bp * NO * 4))
    out = pl.pallas_call(
        conv2_head_kernel,
        out_shape=jax.ShapeDtypeStruct((Bp, 1, NO), jnp.float32),
        grid=(n_steps,),
        in_specs=[
            pl.BlockSpec((bt, P, F), lambda i: (i, 0, 0)),
            pl.BlockSpec((4, F, OC), lambda i: (0, 0, 0)),
            pl.BlockSpec((1, OC), lambda i: (0, 0)),
            pl.BlockSpec((P, OC, NH), lambda i: (0, 0, 0)),
            pl.BlockSpec((1, NH), lambda i: (0, 0)),
            pl.BlockSpec((NH, NO), lambda i: (0, 0)),
            pl.BlockSpec((1, NO), lambda i: (0, 0)),
        ],
        out_specs=pl.BlockSpec((bt, 1, NO), lambda i: (i, 0, 0)),
        compiler_params=pltpu.CompilerParams(
            dimension_semantics=("parallel",),
            vmem_limit_bytes=_VMEM_LIMIT),
        cost_estimate=cost,
    )(p6, w2ph, b2, w1f, b1f, w2fT, b2f)
    out = out.reshape(Bp, NO)
    return out if Bp == B else out[:B]


# ---------------------------------------------------------------------------
# JAX glue (one patch-extraction op per conv; weight prep is trace-time only)
# ---------------------------------------------------------------------------
def _pooled_patches6(x_nhwc):
    """6x6 patches at stride 2 (one XLA op).  Each pooled output position's
    6x6 window contains all four 5x5 receptive fields of its 2x2 max-pool
    window, so conv+pool becomes per-phase GEMMs + a 4-way max.  Feature order
    is channel-major (c, kh6, kw6)."""
    B, H, W, C = x_nhwc.shape
    Ho, Wo = (H - 6) // 2 + 1, (W - 6) // 2 + 1
    p = jax.lax.conv_general_dilated_patches(
        x_nhwc, filter_shape=(6, 6), window_strides=(2, 2), padding="VALID",
        dimension_numbers=("NHWC", "HWIO", "NHWC"))        # (B, Ho, Wo, C*36)
    return p.reshape(B, Ho * Wo, C * 36), Ho, Wo


def _pooled_phase_weights(w):
    """(OC, C, 5, 5) conv weights -> (4, C*36, OC): for pooling phase
    ph=(py,px) the 5x5 kernel is scattered into the (C, 6, 6) footprint of the
    stride-2 6x6 patches (zeros elsewhere).  Trace-time, weights only."""
    OC, C, K, _ = w.shape
    phases = []
    for py in (0, 1):
        for px in (0, 1):
            wp = jnp.pad(w, ((0, 0), (0, 0), (py, 1 - py), (px, 1 - px)))
            phases.append(wp.reshape(OC, C * 36).T)         # (C*36, OC)
    return jnp.stack(phases, axis=0)                        # (4, C*36, OC)


def net_forward(x, params, *, use_bf16=False):
    (w_c1, b_c1, w_c2, b_c2, w_f1, b_f1, w_f2, b_f2) = params
    B = x.shape[0]
    cdt = jnp.bfloat16 if use_bf16 else jnp.float32

    # conv1 (1->10, k5) + maxpool2 + relu.  C=1, so NCHW->NHWC is a reshape.
    x_nhwc = x.reshape(B, 28, 28, 1).astype(cdt)
    p1, Hp1, Wp1 = _pooled_patches6(x_nhwc)                     # (B, 144, 36)
    h1 = conv_pool_relu(p1, _pooled_phase_weights(w_c1).astype(cdt),
                        b_c1.reshape(1, 10))                    # (B, 144, 10)
    h1 = h1.reshape(B, Hp1, Wp1, 10)                            # NHWC, no transpose

    # conv2 + dropout2d(eval) + maxpool2 + relu + flatten + fc1 + relu
    # + dropout(eval) + fc2 + log_softmax: one fused kernel.
    p2, _, _ = _pooled_patches6(h1.astype(cdt))                 # (B, 16, 360)
    # fc1 columns permuted from torch's (c, h, w) flatten order to the
    # kernel's (p=(h,w), c) layout, at trace time on the weights only.
    w1f = jnp.transpose(w_f1.reshape(50, 20, 4, 4),
                        (2, 3, 1, 0)).reshape(16, 20, 50)
    return conv2_mlp_head(p2, _pooled_phase_weights(w_c2).astype(cdt),
                          b_c2.reshape(1, 20), w1f, b_f1.reshape(1, 50),
                          w_f2.T, b_f2.reshape(1, 10))          # (B, 10)


# ---------------------------------------------------------------------------
# Pure-JAX reference (eval-mode torch semantics) for a sanity check
# ---------------------------------------------------------------------------
def _reference_forward(x, params):
    (w_c1, b_c1, w_c2, b_c2, w_f1, b_f1, w_f2, b_f2) = params
    dn = ("NCHW", "OIHW", "NCHW")
    hi = jax.lax.Precision.HIGHEST
    c1 = jax.lax.conv_general_dilated(x, w_c1, (1, 1), "VALID",
                                      dimension_numbers=dn, precision=hi)
    c1 = c1 + b_c1[None, :, None, None]
    h1 = jnp.maximum(jax.lax.reduce_window(c1, -jnp.inf, jax.lax.max,
                                           (1, 1, 2, 2), (1, 1, 2, 2),
                                           "VALID"), 0.0)
    c2 = jax.lax.conv_general_dilated(h1, w_c2, (1, 1), "VALID",
                                      dimension_numbers=dn, precision=hi)
    c2 = c2 + b_c2[None, :, None, None]
    h2 = jnp.maximum(jax.lax.reduce_window(c2, -jnp.inf, jax.lax.max,
                                           (1, 1, 2, 2), (1, 1, 2, 2),
                                           "VALID"), 0.0)
    flat = h2.reshape(h2.shape[0], -1)
    h3 = jnp.maximum(jnp.dot(flat, w_f1.T, precision=hi) + b_f1, 0.0)
    logits = jnp.dot(h3, w_f2.T, precision=hi) + b_f2
    return jax.nn.log_softmax(logits, axis=-1)


# ---------------------------------------------------------------------------
# Main
# ---------------------------------------------------------------------------
if __name__ == "__main__":
    key = jax.random.PRNGKey(0)
    ks = jax.random.split(key, 9)

    # Deterministic synthetic parameters (same shapes as the PyTorch module).
    w_c1 = 0.1 * jax.random.normal(ks[0], (10, 1, 5, 5), jnp.float32)
    b_c1 = 0.1 * jax.random.normal(ks[1], (10,), jnp.float32)
    w_c2 = 0.1 * jax.random.normal(ks[2], (20, 10, 5, 5), jnp.float32)
    b_c2 = 0.1 * jax.random.normal(ks[3], (20,), jnp.float32)
    w_f1 = 0.1 * jax.random.normal(ks[4], (50, 320), jnp.float32)
    b_f1 = 0.1 * jax.random.normal(ks[5], (50,), jnp.float32)
    w_f2 = 0.1 * jax.random.normal(ks[6], (10, 50), jnp.float32)
    b_f2 = 0.1 * jax.random.normal(ks[7], (10,), jnp.float32)
    params = (w_c1, b_c1, w_c2, b_c2, w_f1, b_f1, w_f2, b_f2)

    # Input: MNIST-shaped (the 320-dim flatten fixes 1x28x28), small batch.
    x = jax.random.normal(ks[8], (2, 1, 28, 28), jnp.float32)

    out = jax.jit(lambda xx: net_forward(xx, params))(x)
    out = jax.block_until_ready(out)
    assert out.shape == (2, 10)

    # Numeric sanity check against the pure-JAX reference (loose tolerance:
    # MXU f32 matmul precision may differ slightly from XLA's).
    ref = jax.block_until_ready(_reference_forward(x, params))
    assert float(jnp.max(jnp.abs(out - ref))) < 0.1, "mismatch vs reference"

    print("KERNEL_OK")
</pallas_src>

<mosaic_0001>
module attributes {stable_mosaic.version = 11 : i64} {
  func.func @conv_pool_relu_kernel(%arg0: i32, %arg1: memref<1x144x36xf32, #tpu.memory_space<vmem>>, %arg2: memref<4x36x10xf32, #tpu.memory_space<vmem>>, %arg3: memref<1x10xf32, #tpu.memory_space<vmem>>, %arg4: memref<1x144x10xf32, #tpu.memory_space<vmem>>) attributes {dimension_semantics = [#tpu.dimension_semantics<parallel>], iteration_bounds = array<i64: 2>, scalar_prefetch = 0 : i64, scratch_operands = 0 : i64, tpu.core_type = #tpu.core_type<tc>, window_params = [{transform_indices = @transform_0, window_bounds = array<i64: 1, 144, 36>}, {pipeline_mode = #tpu.pipeline_mode<synchronous>, transform_indices = @transform_1, window_bounds = array<i64: 4, 36, 10>}, {pipeline_mode = #tpu.pipeline_mode<synchronous>, transform_indices = @transform_2, window_bounds = array<i64: 1, 10>}, {transform_indices = @transform_3, window_bounds = array<i64: 1, 144, 10>}]} {
    %c0 = arith.constant 0 : index
    %c0_0 = arith.constant 0 : index
    %c0_1 = arith.constant 0 : index
    %0 = vector.load %arg1[%c0, %c0_0, %c0_1] : memref<1x144x36xf32, #tpu.memory_space<vmem>>, vector<1x144x36xf32>
    %1 = vector.shape_cast %0 : vector<1x144x36xf32> to vector<144x36xf32>
    %c0_2 = arith.constant 0 : index
    %c0_3 = arith.constant 0 : index
    %c0_4 = arith.constant 0 : index
    %2 = vector.load %arg2[%c0_2, %c0_3, %c0_4] : memref<4x36x10xf32, #tpu.memory_space<vmem>>, vector<1x36x10xf32>
    %3 = vector.shape_cast %2 : vector<1x36x10xf32> to vector<36x10xf32>
    %cst = arith.constant dense<0.000000e+00> : vector<144x10xf32>
    %4 = tpu.matmul %1, %3, %cst {dimension_numbers = #tpu.dot_dimension_numbers<[1], [0], [0], [1], [0, 0, 1, 1], [], []>} : vector<144x36xf32>, vector<36x10xf32>, vector<144x10xf32> -> vector<144x10xf32>
    %c1 = arith.constant 1 : index
    %c0_5 = arith.constant 0 : index
    %c0_6 = arith.constant 0 : index
    %5 = vector.load %arg2[%c1, %c0_5, %c0_6] : memref<4x36x10xf32, #tpu.memory_space<vmem>>, vector<1x36x10xf32>
    %6 = vector.shape_cast %5 : vector<1x36x10xf32> to vector<36x10xf32>
    %cst_7 = arith.constant dense<0.000000e+00> : vector<144x10xf32>
    %7 = tpu.matmul %1, %6, %cst_7 {dimension_numbers = #tpu.dot_dimension_numbers<[1], [0], [0], [1], [0, 0, 1, 1], [], []>} : vector<144x36xf32>, vector<36x10xf32>, vector<144x10xf32> -> vector<144x10xf32>
    %8 = arith.maximumf %4, %7 : vector<144x10xf32>
    %c2 = arith.constant 2 : index
    %c0_8 = arith.constant 0 : index
    %c0_9 = arith.constant 0 : index
    %9 = vector.load %arg2[%c2, %c0_8, %c0_9] : memref<4x36x10xf32, #tpu.memory_space<vmem>>, vector<1x36x10xf32>
    %10 = vector.shape_cast %9 : vector<1x36x10xf32> to vector<36x10xf32>
    %cst_10 = arith.constant dense<0.000000e+00> : vector<144x10xf32>
    %11 = tpu.matmul %1, %10, %cst_10 {dimension_numbers = #tpu.dot_dimension_numbers<[1], [0], [0], [1], [0, 0, 1, 1], [], []>} : vector<144x36xf32>, vector<36x10xf32>, vector<144x10xf32> -> vector<144x10xf32>
    %12 = arith.maximumf %8, %11 : vector<144x10xf32>
    %c3 = arith.constant 3 : index
    %c0_11 = arith.constant 0 : index
    %c0_12 = arith.constant 0 : index
    %13 = vector.load %arg2[%c3, %c0_11, %c0_12] : memref<4x36x10xf32, #tpu.memory_space<vmem>>, vector<1x36x10xf32>
    %14 = vector.shape_cast %13 : vector<1x36x10xf32> to vector<36x10xf32>
    %cst_13 = arith.constant dense<0.000000e+00> : vector<144x10xf32>
    %15 = tpu.matmul %1, %14, %cst_13 {dimension_numbers = #tpu.dot_dimension_numbers<[1], [0], [0], [1], [0, 0, 1, 1], [], []>} : vector<144x36xf32>, vector<36x10xf32>, vector<144x10xf32> -> vector<144x10xf32>
    %16 = arith.maximumf %12, %15 : vector<144x10xf32>
    %17 = vector.shape_cast %16 : vector<144x10xf32> to vector<1x144x10xf32>
    %c0_14 = arith.constant 0 : index
    %c0_15 = arith.constant 0 : index
    %18 = vector.load %arg3[%c0_14, %c0_15] : memref<1x10xf32, #tpu.memory_space<vmem>>, vector<1x10xf32>
    %19 = vector.shape_cast %18 : vector<1x10xf32> to vector<1x1x10xf32>
    %20 = vector.broadcast %19 : vector<1x1x10xf32> to vector<1x144x10xf32>
    %21 = arith.addf %17, %20 : vector<1x144x10xf32>
    %cst_16 = arith.constant 0.000000e+00 : f32
    %22 = vector.broadcast %cst_16 : f32 to vector<1x144x10xf32>
    %23 = arith.maximumf %21, %22 : vector<1x144x10xf32>
    %c0_17 = arith.constant 0 : index
    %c0_18 = arith.constant 0 : index
    %c0_19 = arith.constant 0 : index
    %24 = vector.load %arg4[%c0_17, %c0_18, %c0_19] : memref<1x144x10xf32, #tpu.memory_space<vmem>>, vector<1x144x10xf32>
    tpu.vector_store %arg4[%c0_17, %c0_18, %c0_19], %23 {strides = array<i32>} : memref<1x144x10xf32, #tpu.memory_space<vmem>>, vector<1x144x10xf32>,
    return
  }
  func.func @transform_0(%arg0: i32) -> (i32, i32, i32) {
    %c0_i32 = arith.constant 0 : i32
    %c0_i32_0 = arith.constant 0 : i32
    %c0_i32_1 = arith.constant 0 : i32
    return %arg0, %c0_i32, %c0_i32_0 : i32, i32, i32
  }
  func.func @transform_1(%arg0: i32) -> (i32, i32, i32) {
    %c0_i32 = arith.constant 0 : i32
    %c0_i32_0 = arith.constant 0 : i32
    %c0_i32_1 = arith.constant 0 : i32
    %c0_i32_2 = arith.constant 0 : i32
    return %c0_i32, %c0_i32_0, %c0_i32_1 : i32, i32, i32
  }
  func.func @transform_2(%arg0: i32) -> (i32, i32) {
    %c0_i32 = arith.constant 0 : i32
    %c0_i32_0 = arith.constant 0 : i32
    %c0_i32_1 = arith.constant 0 : i32
    return %c0_i32, %c0_i32_0 : i32, i32
  }
  func.func @transform_3(%arg0: i32) -> (i32, i32, i32) {
    %c0_i32 = arith.constant 0 : i32
    %c0_i32_0 = arith.constant 0 : i32
    %c0_i32_1 = arith.constant 0 : i32
    return %arg0, %c0_i32, %c0_i32_0 : i32, i32, i32
  }
}

module attributes {stable_mosaic.version = 11 : i64} {
  func.func @conv2_head_kernel(%arg0: i32, %arg1: memref<1x16x360xf32, #tpu.memory_space<vmem>>, %arg2: memref<4x360x20xf32, #tpu.memory_space<vmem>>, %arg3: memref<1x20xf32, #tpu.memory_space<vmem>>, %arg4: memref<16x20x50xf32, #tpu.memory_space<vmem>>, %arg5: memref<1x50xf32, #tpu.memory_space<vmem>>, %arg6: memref<50x10xf32, #tpu.memory_space<vmem>>, %arg7: memref<1x10xf32, #tpu.memory_space<vmem>>, %arg8: memref<1x1x10xf32, #tpu.memory_space<vmem>>) attributes {dimension_semantics = [#tpu.dimension_semantics<parallel>], iteration_bounds = array<i64: 2>, scalar_prefetch = 0 : i64, scratch_operands = 0 : i64, tpu.core_type = #tpu.core_type<tc>, window_params = [{transform_indices = @transform_0, window_bounds = array<i64: 1, 16, 360>}, {pipeline_mode = #tpu.pipeline_mode<synchronous>, transform_indices = @transform_1, window_bounds = array<i64: 4, 360, 20>}, {pipeline_mode = #tpu.pipeline_mode<synchronous>, transform_indices = @transform_2, window_bounds = array<i64: 1, 20>}, {pipeline_mode = #tpu.pipeline_mode<synchronous>, transform_indices = @transform_3, window_bounds = array<i64: 16, 20, 50>}, {pipeline_mode = #tpu.pipeline_mode<synchronous>, transform_indices = @transform_4, window_bounds = array<i64: 1, 50>}, {pipeline_mode = #tpu.pipeline_mode<synchronous>, transform_indices = @transform_5, window_bounds = array<i64: 50, 10>}, {pipeline_mode = #tpu.pipeline_mode<synchronous>, transform_indices = @transform_6, window_bounds = array<i64: 1, 10>}, {transform_indices = @transform_7, window_bounds = array<i64: 1, 1, 10>}]} {
    %c0 = arith.constant 0 : index
    %c0_0 = arith.constant 0 : index
    %c0_1 = arith.constant 0 : index
    %0 = vector.load %arg1[%c0, %c0_0, %c0_1] : memref<1x16x360xf32, #tpu.memory_space<vmem>>, vector<1x16x360xf32>
    %1 = vector.shape_cast %0 : vector<1x16x360xf32> to vector<16x360xf32>
    %c0_2 = arith.constant 0 : index
    %c0_3 = arith.constant 0 : index
    %c0_4 = arith.constant 0 : index
    %2 = vector.load %arg2[%c0_2, %c0_3, %c0_4] : memref<4x360x20xf32, #tpu.memory_space<vmem>>, vector<1x360x20xf32>
    %3 = vector.shape_cast %2 : vector<1x360x20xf32> to vector<360x20xf32>
    %cst = arith.constant dense<0.000000e+00> : vector<16x20xf32>
    %4 = tpu.matmul %1, %3, %cst {dimension_numbers = #tpu.dot_dimension_numbers<[1], [0], [0], [1], [0, 0, 1, 1], [], []>} : vector<16x360xf32>, vector<360x20xf32>, vector<16x20xf32> -> vector<16x20xf32>
    %c1 = arith.constant 1 : index
    %c0_5 = arith.constant 0 : index
    %c0_6 = arith.constant 0 : index
    %5 = vector.load %arg2[%c1, %c0_5, %c0_6] : memref<4x360x20xf32, #tpu.memory_space<vmem>>, vector<1x360x20xf32>
    %6 = vector.shape_cast %5 : vector<1x360x20xf32> to vector<360x20xf32>
    %cst_7 = arith.constant dense<0.000000e+00> : vector<16x20xf32>
    %7 = tpu.matmul %1, %6, %cst_7 {dimension_numbers = #tpu.dot_dimension_numbers<[1], [0], [0], [1], [0, 0, 1, 1], [], []>} : vector<16x360xf32>, vector<360x20xf32>, vector<16x20xf32> -> vector<16x20xf32>
    %8 = arith.maximumf %4, %7 : vector<16x20xf32>
    %c2 = arith.constant 2 : index
    %c0_8 = arith.constant 0 : index
    %c0_9 = arith.constant 0 : index
    %9 = vector.load %arg2[%c2, %c0_8, %c0_9] : memref<4x360x20xf32, #tpu.memory_space<vmem>>, vector<1x360x20xf32>
    %10 = vector.shape_cast %9 : vector<1x360x20xf32> to vector<360x20xf32>
    %cst_10 = arith.constant dense<0.000000e+00> : vector<16x20xf32>
    %11 = tpu.matmul %1, %10, %cst_10 {dimension_numbers = #tpu.dot_dimension_numbers<[1], [0], [0], [1], [0, 0, 1, 1], [], []>} : vector<16x360xf32>, vector<360x20xf32>, vector<16x20xf32> -> vector<16x20xf32>
    %12 = arith.maximumf %8, %11 : vector<16x20xf32>
    %c3 = arith.constant 3 : index
    %c0_11 = arith.constant 0 : index
    %c0_12 = arith.constant 0 : index
    %13 = vector.load %arg2[%c3, %c0_11, %c0_12] : memref<4x360x20xf32, #tpu.memory_space<vmem>>, vector<1x360x20xf32>
    %14 = vector.shape_cast %13 : vector<1x360x20xf32> to vector<360x20xf32>
    %cst_13 = arith.constant dense<0.000000e+00> : vector<16x20xf32>
    %15 = tpu.matmul %1, %14, %cst_13 {dimension_numbers = #tpu.dot_dimension_numbers<[1], [0], [0], [1], [0, 0, 1, 1], [], []>} : vector<16x360xf32>, vector<360x20xf32>, vector<16x20xf32> -> vector<16x20xf32>
    %16 = arith.maximumf %12, %15 : vector<16x20xf32>
    %17 = vector.shape_cast %16 : vector<16x20xf32> to vector<1x16x20xf32>
    %c0_14 = arith.constant 0 : index
    %c0_15 = arith.constant 0 : index
    %18 = vector.load %arg3[%c0_14, %c0_15] : memref<1x20xf32, #tpu.memory_space<vmem>>, vector<1x20xf32>
    %19 = vector.shape_cast %18 : vector<1x20xf32> to vector<1x1x20xf32>
    %20 = vector.broadcast %19 : vector<1x1x20xf32> to vector<1x16x20xf32>
    %21 = arith.addf %17, %20 : vector<1x16x20xf32>
    %cst_16 = arith.constant 0.000000e+00 : f32
    %22 = vector.broadcast %cst_16 : f32 to vector<1x16x20xf32>
    %23 = arith.maximumf %21, %22 : vector<1x16x20xf32>
    %cst_17 = arith.constant 0.000000e+00 : f32
    %24 = vector.broadcast %cst_17 : f32 to vector<1x50xf32>
    %25 = vector.extract_strided_slice %23 {offsets = [0, 0, 0], sizes = [1, 1, 20], strides = [1, 1, 1]} : vector<1x16x20xf32> to vector<1x1x20xf32>
    %26 = vector.shape_cast %25 : vector<1x1x20xf32> to vector<1x20xf32>
    %c0_18 = arith.constant 0 : index
    %c0_19 = arith.constant 0 : index
    %c0_20 = arith.constant 0 : index
    %27 = vector.load %arg4[%c0_18, %c0_19, %c0_20] : memref<16x20x50xf32, #tpu.memory_space<vmem>>, vector<1x20x50xf32>
    %28 = vector.shape_cast %27 : vector<1x20x50xf32> to vector<20x50xf32>
    %cst_21 = arith.constant dense<0.000000e+00> : vector<1x50xf32>
    %29 = tpu.matmul %26, %28, %cst_21 {dimension_numbers = #tpu.dot_dimension_numbers<[1], [0], [0], [1], [0, 0, 1, 1], [], []>} : vector<1x20xf32>, vector<20x50xf32>, vector<1x50xf32> -> vector<1x50xf32>
    %30 = arith.addf %24, %29 : vector<1x50xf32>
    %31 = vector.extract_strided_slice %23 {offsets = [0, 1, 0], sizes = [1, 1, 20], strides = [1, 1, 1]} : vector<1x16x20xf32> to vector<1x1x20xf32>
    %32 = vector.shape_cast %31 : vector<1x1x20xf32> to vector<1x20xf32>
    %c1_22 = arith.constant 1 : index
    %c0_23 = arith.constant 0 : index
    %c0_24 = arith.constant 0 : index
    %33 = vector.load %arg4[%c1_22, %c0_23, %c0_24] : memref<16x20x50xf32, #tpu.memory_space<vmem>>, vector<1x20x50xf32>
    %34 = vector.shape_cast %33 : vector<1x20x50xf32> to vector<20x50xf32>
    %cst_25 = arith.constant dense<0.000000e+00> : vector<1x50xf32>
    %35 = tpu.matmul %32, %34, %cst_25 {dimension_numbers = #tpu.dot_dimension_numbers<[1], [0], [0], [1], [0, 0, 1, 1], [], []>} : vector<1x20xf32>, vector<20x50xf32>, vector<1x50xf32> -> vector<1x50xf32>
    %36 = arith.addf %30, %35 : vector<1x50xf32>
    %37 = vector.extract_strided_slice %23 {offsets = [0, 2, 0], sizes = [1, 1, 20], strides = [1, 1, 1]} : vector<1x16x20xf32> to vector<1x1x20xf32>
    %38 = vector.shape_cast %37 : vector<1x1x20xf32> to vector<1x20xf32>
    %c2_26 = arith.constant 2 : index
    %c0_27 = arith.constant 0 : index
    %c0_28 = arith.constant 0 : index
    %39 = vector.load %arg4[%c2_26, %c0_27, %c0_28] : memref<16x20x50xf32, #tpu.memory_space<vmem>>, vector<1x20x50xf32>
    %40 = vector.shape_cast %39 : vector<1x20x50xf32> to vector<20x50xf32>
    %cst_29 = arith.constant dense<0.000000e+00> : vector<1x50xf32>
    %41 = tpu.matmul %38, %40, %cst_29 {dimension_numbers = #tpu.dot_dimension_numbers<[1], [0], [0], [1], [0, 0, 1, 1], [], []>} : vector<1x20xf32>, vector<20x50xf32>, vector<1x50xf32> -> vector<1x50xf32>
    %42 = arith.addf %36, %41 : vector<1x50xf32>
    %43 = vector.extract_strided_slice %23 {offsets = [0, 3, 0], sizes = [1, 1, 20], strides = [1, 1, 1]} : vector<1x16x20xf32> to vector<1x1x20xf32>
    %44 = vector.shape_cast %43 : vector<1x1x20xf32> to vector<1x20xf32>
    %c3_30 = arith.constant 3 : index
    %c0_31 = arith.constant 0 : index
    %c0_32 = arith.constant 0 : index
    %45 = vector.load %arg4[%c3_30, %c0_31, %c0_32] : memref<16x20x50xf32, #tpu.memory_space<vmem>>, vector<1x20x50xf32>
    %46 = vector.shape_cast %45 : vector<1x20x50xf32> to vector<20x50xf32>
    %cst_33 = arith.constant dense<0.000000e+00> : vector<1x50xf32>
    %47 = tpu.matmul %44, %46, %cst_33 {dimension_numbers = #tpu.dot_dimension_numbers<[1], [0], [0], [1], [0, 0, 1, 1], [], []>} : vector<1x20xf32>, vector<20x50xf32>, vector<1x50xf32> -> vector<1x50xf32>
    %48 = arith.addf %42, %47 : vector<1x50xf32>
    %49 = vector.extract_strided_slice %23 {offsets = [0, 4, 0], sizes = [1, 1, 20], strides = [1, 1, 1]} : vector<1x16x20xf32> to vector<1x1x20xf32>
    %50 = vector.shape_cast %49 : vector<1x1x20xf32> to vector<1x20xf32>
    %c4 = arith.constant 4 : index
    %c0_34 = arith.constant 0 : index
    %c0_35 = arith.constant 0 : index
    %51 = vector.load %arg4[%c4, %c0_34, %c0_35] : memref<16x20x50xf32, #tpu.memory_space<vmem>>, vector<1x20x50xf32>
    %52 = vector.shape_cast %51 : vector<1x20x50xf32> to vector<20x50xf32>
    %cst_36 = arith.constant dense<0.000000e+00> : vector<1x50xf32>
    %53 = tpu.matmul %50, %52, %cst_36 {dimension_numbers = #tpu.dot_dimension_numbers<[1], [0], [0], [1], [0, 0, 1, 1], [], []>} : vector<1x20xf32>, vector<20x50xf32>, vector<1x50xf32> -> vector<1x50xf32>
    %54 = arith.addf %48, %53 : vector<1x50xf32>
    %55 = vector.extract_strided_slice %23 {offsets = [0, 5, 0], sizes = [1, 1, 20], strides = [1, 1, 1]} : vector<1x16x20xf32> to vector<1x1x20xf32>
    %56 = vector.shape_cast %55 : vector<1x1x20xf32> to vector<1x20xf32>
    %c5 = arith.constant 5 : index
    %c0_37 = arith.constant 0 : index
    %c0_38 = arith.constant 0 : index
    %57 = vector.load %arg4[%c5, %c0_37, %c0_38] : memref<16x20x50xf32, #tpu.memory_space<vmem>>, vector<1x20x50xf32>
    %58 = vector.shape_cast %57 : vector<1x20x50xf32> to vector<20x50xf32>
    %cst_39 = arith.constant dense<0.000000e+00> : vector<1x50xf32>
    %59 = tpu.matmul %56, %58, %cst_39 {dimension_numbers = #tpu.dot_dimension_numbers<[1], [0], [0], [1], [0, 0, 1, 1], [], []>} : vector<1x20xf32>, vector<20x50xf32>, vector<1x50xf32> -> vector<1x50xf32>
    %60 = arith.addf %54, %59 : vector<1x50xf32>
    %61 = vector.extract_strided_slice %23 {offsets = [0, 6, 0], sizes = [1, 1, 20], strides = [1, 1, 1]} : vector<1x16x20xf32> to vector<1x1x20xf32>
    %62 = vector.shape_cast %61 : vector<1x1x20xf32> to vector<1x20xf32>
    %c6 = arith.constant 6 : index
    %c0_40 = arith.constant 0 : index
    %c0_41 = arith.constant 0 : index
    %63 = vector.load %arg4[%c6, %c0_40, %c0_41] : memref<16x20x50xf32, #tpu.memory_space<vmem>>, vector<1x20x50xf32>
    %64 = vector.shape_cast %63 : vector<1x20x50xf32> to vector<20x50xf32>
    %cst_42 = arith.constant dense<0.000000e+00> : vector<1x50xf32>
    %65 = tpu.matmul %62, %64, %cst_42 {dimension_numbers = #tpu.dot_dimension_numbers<[1], [0], [0], [1], [0, 0, 1, 1], [], []>} : vector<1x20xf32>, vector<20x50xf32>, vector<1x50xf32> -> vector<1x50xf32>
    %66 = arith.addf %60, %65 : vector<1x50xf32>
    %67 = vector.extract_strided_slice %23 {offsets = [0, 7, 0], sizes = [1, 1, 20], strides = [1, 1, 1]} : vector<1x16x20xf32> to vector<1x1x20xf32>
    %68 = vector.shape_cast %67 : vector<1x1x20xf32> to vector<1x20xf32>
    %c7 = arith.constant 7 : index
    %c0_43 = arith.constant 0 : index
    %c0_44 = arith.constant 0 : index
    %69 = vector.load %arg4[%c7, %c0_43, %c0_44] : memref<16x20x50xf32, #tpu.memory_space<vmem>>, vector<1x20x50xf32>
    %70 = vector.shape_cast %69 : vector<1x20x50xf32> to vector<20x50xf32>
    %cst_45 = arith.constant dense<0.000000e+00> : vector<1x50xf32>
    %71 = tpu.matmul %68, %70, %cst_45 {dimension_numbers = #tpu.dot_dimension_numbers<[1], [0], [0], [1], [0, 0, 1, 1], [], []>} : vector<1x20xf32>, vector<20x50xf32>, vector<1x50xf32> -> vector<1x50xf32>
    %72 = arith.addf %66, %71 : vector<1x50xf32>
    %73 = vector.extract_strided_slice %23 {offsets = [0, 8, 0], sizes = [1, 1, 20], strides = [1, 1, 1]} : vector<1x16x20xf32> to vector<1x1x20xf32>
    %74 = vector.shape_cast %73 : vector<1x1x20xf32> to vector<1x20xf32>
    %c8 = arith.constant 8 : index
    %c0_46 = arith.constant 0 : index
    %c0_47 = arith.constant 0 : index
    %75 = vector.load %arg4[%c8, %c0_46, %c0_47] : memref<16x20x50xf32, #tpu.memory_space<vmem>>, vector<1x20x50xf32>
    %76 = vector.shape_cast %75 : vector<1x20x50xf32> to vector<20x50xf32>
    %cst_48 = arith.constant dense<0.000000e+00> : vector<1x50xf32>
    %77 = tpu.matmul %74, %76, %cst_48 {dimension_numbers = #tpu.dot_dimension_numbers<[1], [0], [0], [1], [0, 0, 1, 1], [], []>} : vector<1x20xf32>, vector<20x50xf32>, vector<1x50xf32> -> vector<1x50xf32>
    %78 = arith.addf %72, %77 : vector<1x50xf32>
    %79 = vector.extract_strided_slice %23 {offsets = [0, 9, 0], sizes = [1, 1, 20], strides = [1, 1, 1]} : vector<1x16x20xf32> to vector<1x1x20xf32>
    %80 = vector.shape_cast %79 : vector<1x1x20xf32> to vector<1x20xf32>
    %c9 = arith.constant 9 : index
    %c0_49 = arith.constant 0 : index
    %c0_50 = arith.constant 0 : index
    %81 = vector.load %arg4[%c9, %c0_49, %c0_50] : memref<16x20x50xf32, #tpu.memory_space<vmem>>, vector<1x20x50xf32>
    %82 = vector.shape_cast %81 : vector<1x20x50xf32> to vector<20x50xf32>
    %cst_51 = arith.constant dense<0.000000e+00> : vector<1x50xf32>
    %83 = tpu.matmul %80, %82, %cst_51 {dimension_numbers = #tpu.dot_dimension_numbers<[1], [0], [0], [1], [0, 0, 1, 1], [], []>} : vector<1x20xf32>, vector<20x50xf32>, vector<1x50xf32> -> vector<1x50xf32>
    %84 = arith.addf %78, %83 : vector<1x50xf32>
    %85 = vector.extract_strided_slice %23 {offsets = [0, 10, 0], sizes = [1, 1, 20], strides = [1, 1, 1]} : vector<1x16x20xf32> to vector<1x1x20xf32>
    %86 = vector.shape_cast %85 : vector<1x1x20xf32> to vector<1x20xf32>
    %c10 = arith.constant 10 : index
    %c0_52 = arith.constant 0 : index
    %c0_53 = arith.constant 0 : index
    %87 = vector.load %arg4[%c10, %c0_52, %c0_53] : memref<16x20x50xf32, #tpu.memory_space<vmem>>, vector<1x20x50xf32>
    %88 = vector.shape_cast %87 : vector<1x20x50xf32> to vector<20x50xf32>
    %cst_54 = arith.constant dense<0.000000e+00> : vector<1x50xf32>
    %89 = tpu.matmul %86, %88, %cst_54 {dimension_numbers = #tpu.dot_dimension_numbers<[1], [0], [0], [1], [0, 0, 1, 1], [], []>} : vector<1x20xf32>, vector<20x50xf32>, vector<1x50xf32> -> vector<1x50xf32>
    %90 = arith.addf %84, %89 : vector<1x50xf32>
    %91 = vector.extract_strided_slice %23 {offsets = [0, 11, 0], sizes = [1, 1, 20], strides = [1, 1, 1]} : vector<1x16x20xf32> to vector<1x1x20xf32>
    %92 = vector.shape_cast %91 : vector<1x1x20xf32> to vector<1x20xf32>
    %c11 = arith.constant 11 : index
    %c0_55 = arith.constant 0 : index
    %c0_56 = arith.constant 0 : index
    %93 = vector.load %arg4[%c11, %c0_55, %c0_56] : memref<16x20x50xf32, #tpu.memory_space<vmem>>, vector<1x20x50xf32>
    %94 = vector.shape_cast %93 : vector<1x20x50xf32> to vector<20x50xf32>
    %cst_57 = arith.constant dense<0.000000e+00> : vector<1x50xf32>
    %95 = tpu.matmul %92, %94, %cst_57 {dimension_numbers = #tpu.dot_dimension_numbers<[1], [0], [0], [1], [0, 0, 1, 1], [], []>} : vector<1x20xf32>, vector<20x50xf32>, vector<1x50xf32> -> vector<1x50xf32>
    %96 = arith.addf %90, %95 : vector<1x50xf32>
    %97 = vector.extract_strided_slice %23 {offsets = [0, 12, 0], sizes = [1, 1, 20], strides = [1, 1, 1]} : vector<1x16x20xf32> to vector<1x1x20xf32>
    %98 = vector.shape_cast %97 : vector<1x1x20xf32> to vector<1x20xf32>
    %c12 = arith.constant 12 : index
    %c0_58 = arith.constant 0 : index
    %c0_59 = arith.constant 0 : index
    %99 = vector.load %arg4[%c12, %c0_58, %c0_59] : memref<16x20x50xf32, #tpu.memory_space<vmem>>, vector<1x20x50xf32>
    %100 = vector.shape_cast %99 : vector<1x20x50xf32> to vector<20x50xf32>
    %cst_60 = arith.constant dense<0.000000e+00> : vector<1x50xf32>
    %101 = tpu.matmul %98, %100, %cst_60 {dimension_numbers = #tpu.dot_dimension_numbers<[1], [0], [0], [1], [0, 0, 1, 1], [], []>} : vector<1x20xf32>, vector<20x50xf32>, vector<1x50xf32> -> vector<1x50xf32>
    %102 = arith.addf %96, %101 : vector<1x50xf32>
    %103 = vector.extract_strided_slice %23 {offsets = [0, 13, 0], sizes = [1, 1, 20], strides = [1, 1, 1]} : vector<1x16x20xf32> to vector<1x1x20xf32>
    %104 = vector.shape_cast %103 : vector<1x1x20xf32> to vector<1x20xf32>
    %c13 = arith.constant 13 : index
    %c0_61 = arith.constant 0 : index
    %c0_62 = arith.constant 0 : index
    %105 = vector.load %arg4[%c13, %c0_61, %c0_62] : memref<16x20x50xf32, #tpu.memory_space<vmem>>, vector<1x20x50xf32>
    %106 = vector.shape_cast %105 : vector<1x20x50xf32> to vector<20x50xf32>
    %cst_63 = arith.constant dense<0.000000e+00> : vector<1x50xf32>
    %107 = tpu.matmul %104, %106, %cst_63 {dimension_numbers = #tpu.dot_dimension_numbers<[1], [0], [0], [1], [0, 0, 1, 1], [], []>} : vector<1x20xf32>, vector<20x50xf32>, vector<1x50xf32> -> vector<1x50xf32>
    %108 = arith.addf %102, %107 : vector<1x50xf32>
    %109 = vector.extract_strided_slice %23 {offsets = [0, 14, 0], sizes = [1, 1, 20], strides = [1, 1, 1]} : vector<1x16x20xf32> to vector<1x1x20xf32>
    %110 = vector.shape_cast %109 : vector<1x1x20xf32> to vector<1x20xf32>
    %c14 = arith.constant 14 : index
    %c0_64 = arith.constant 0 : index
    %c0_65 = arith.constant 0 : index
    %111 = vector.load %arg4[%c14, %c0_64, %c0_65] : memref<16x20x50xf32, #tpu.memory_space<vmem>>, vector<1x20x50xf32>
    %112 = vector.shape_cast %111 : vector<1x20x50xf32> to vector<20x50xf32>
    %cst_66 = arith.constant dense<0.000000e+00> : vector<1x50xf32>
    %113 = tpu.matmul %110, %112, %cst_66 {dimension_numbers = #tpu.dot_dimension_numbers<[1], [0], [0], [1], [0, 0, 1, 1], [], []>} : vector<1x20xf32>, vector<20x50xf32>, vector<1x50xf32> -> vector<1x50xf32>
    %114 = arith.addf %108, %113 : vector<1x50xf32>
    %115 = vector.extract_strided_slice %23 {offsets = [0, 15, 0], sizes = [1, 1, 20], strides = [1, 1, 1]} : vector<1x16x20xf32> to vector<1x1x20xf32>
    %116 = vector.shape_cast %115 : vector<1x1x20xf32> to vector<1x20xf32>
    %c15 = arith.constant 15 : index
    %c0_67 = arith.constant 0 : index
    %c0_68 = arith.constant 0 : index
    %117 = vector.load %arg4[%c15, %c0_67, %c0_68] : memref<16x20x50xf32, #tpu.memory_space<vmem>>, vector<1x20x50xf32>
    %118 = vector.shape_cast %117 : vector<1x20x50xf32> to vector<20x50xf32>
    %cst_69 = arith.constant dense<0.000000e+00> : vector<1x50xf32>
    %119 = tpu.matmul %116, %118, %cst_69 {dimension_numbers = #tpu.dot_dimension_numbers<[1], [0], [0], [1], [0, 0, 1, 1], [], []>} : vector<1x20xf32>, vector<20x50xf32>, vector<1x50xf32> -> vector<1x50xf32>
    %120 = arith.addf %114, %119 : vector<1x50xf32>
    %c0_70 = arith.constant 0 : index
    %c0_71 = arith.constant 0 : index
    %121 = vector.load %arg5[%c0_70, %c0_71] : memref<1x50xf32, #tpu.memory_space<vmem>>, vector<1x50xf32>
    %122 = arith.addf %120, %121 : vector<1x50xf32>
    %cst_72 = arith.constant 0.000000e+00 : f32
    %123 = vector.broadcast %cst_72 : f32 to vector<1x50xf32>
    %124 = arith.maximumf %122, %123 : vector<1x50xf32>
    %c0_73 = arith.constant 0 : index
    %c0_74 = arith.constant 0 : index
    %125 = vector.load %arg6[%c0_73, %c0_74] : memref<50x10xf32, #tpu.memory_space<vmem>>, vector<50x10xf32>
    %cst_75 = arith.constant dense<0.000000e+00> : vector<1x10xf32>
    %126 = tpu.matmul %124, %125, %cst_75 {dimension_numbers = #tpu.dot_dimension_numbers<[1], [0], [0], [1], [0, 0, 1, 1], [], []>} : vector<1x50xf32>, vector<50x10xf32>, vector<1x10xf32> -> vector<1x10xf32>
    %c0_76 = arith.constant 0 : index
    %c0_77 = arith.constant 0 : index
    %127 = vector.load %arg7[%c0_76, %c0_77] : memref<1x10xf32, #tpu.memory_space<vmem>>, vector<1x10xf32>
    %128 = arith.addf %126, %127 : vector<1x10xf32>
    %cst_78 = arith.constant dense<0xFF800000> : vector<1xf32>
    %129 = vector.multi_reduction <maximumf>, %128, %cst_78 [1] : vector<1x10xf32> to vector<1xf32>
    %130 = vector.shape_cast %129 : vector<1xf32> to vector<1x1xf32>
    %131 = vector.broadcast %130 : vector<1x1xf32> to vector<1x10xf32>
    %132 = arith.subf %128, %131 : vector<1x10xf32>
    %133 = math.exp %132 : vector<1x10xf32>
    %cst_79 = arith.constant dense<0.000000e+00> : vector<1xf32>
    %134 = vector.multi_reduction <add>, %133, %cst_79 [1] : vector<1x10xf32> to vector<1xf32>
    %135 = vector.shape_cast %134 : vector<1xf32> to vector<1x1xf32>
    %136 = math.log %135 : vector<1x1xf32>
    %137 = arith.addf %130, %136 : vector<1x1xf32>
    %138 = vector.broadcast %137 : vector<1x1xf32> to vector<1x10xf32>
    %139 = arith.subf %128, %138 : vector<1x10xf32>
    %140 = vector.shape_cast %139 : vector<1x10xf32> to vector<1x1x10xf32>
    %c0_80 = arith.constant 0 : index
    %c0_81 = arith.constant 0 : index
    %c0_82 = arith.constant 0 : index
    %141 = vector.load %arg8[%c0_80, %c0_81, %c0_82] : memref<1x1x10xf32, #tpu.memory_space<vmem>>, vector<1x1x10xf32>
    tpu.vector_store %arg8[%c0_80, %c0_81, %c0_82], %140 {strides = array<i32>} : memref<1x1x10xf32, #tpu.memory_space<vmem>>, vector<1x1x10xf32>,
    return
  }
  func.func @transform_0(%arg0: i32) -> (i32, i32, i32) {
    %c0_i32 = arith.constant 0 : i32
    %c0_i32_0 = arith.constant 0 : i32
    %c0_i32_1 = arith.constant 0 : i32
    return %arg0, %c0_i32, %c0_i32_0 : i32, i32, i32
  }
  func.func @transform_1(%arg0: i32) -> (i32, i32, i32) {
    %c0_i32 = arith.constant 0 : i32
    %c0_i32_0 = arith.constant 0 : i32
    %c0_i32_1 = arith.constant 0 : i32
    %c0_i32_2 = arith.constant 0 : i32
    return %c0_i32, %c0_i32_0, %c0_i32_1 : i32, i32, i32
  }
  func.func @transform_2(%arg0: i32) -> (i32, i32) {
    %c0_i32 = arith.constant 0 : i32
    %c0_i32_0 = arith.constant 0 : i32
    %c0_i32_1 = arith.constant 0 : i32
    return %c0_i32, %c0_i32_0 : i32, i32
  }
  func.func @transform_3(%arg0: i32) -> (i32, i32, i32) {
    %c0_i32 = arith.constant 0 : i32
    %c0_i32_0 = arith.constant 0 : i32
    %c0_i32_1 = arith.constant 0 : i32
    %c0_i32_2 = arith.constant 0 : i32
    return %c0_i32, %c0_i32_0, %c0_i32_1 : i32, i32, i32
  }
  func.func @transform_4(%arg0: i32) -> (i32, i32) {
    %c0_i32 = arith.constant 0 : i32
    %c0_i32_0 = arith.constant 0 : i32
    %c0_i32_1 = arith.constant 0 : i32
    return %c0_i32, %c0_i32_0 : i32, i32
  }
  func.func @transform_5(%arg0: i32) -> (i32, i32) {
    %c0_i32 = arith.constant 0 : i32
    %c0_i32_0 = arith.constant 0 : i32
    %c0_i32_1 = arith.constant 0 : i32
    return %c0_i32, %c0_i32_0 : i32, i32
  }
  func.func @transform_6(%arg0: i32) -> (i32, i32) {
    %c0_i32 = arith.constant 0 : i32
    %c0_i32_0 = arith.constant 0 : i32
    %c0_i32_1 = arith.constant 0 : i32
    return %c0_i32, %c0_i32_0 : i32, i32
  }
  func.func @transform_7(%arg0: i32) -> (i32, i32, i32) {
    %c0_i32 = arith.constant 0 : i32
    %c0_i32_0 = arith.constant 0 : i32
    %c0_i32_1 = arith.constant 0 : i32
    return %arg0, %c0_i32, %c0_i32_0 : i32, i32, i32
  }
}

</mosaic_0001>

<bundles_post_ra>
// kernel: _lambda_.2
= control target key start
LH: loop header
LB: loop body
LE: loop exit
PB: predicated region body
PF: predicated region fallthrough
CT: control target
= control target key end

     0   :  { %s870_s12 = smov 0   ;;  %s1107_s0 = inlined_call_operand.vmem [shape: f32[2,144,36], index: 0, kind: input, shape index: {}]   ;;  %s1108_s1 = inlined_call_operand.vmem [shape: f32[4,36,10], index: 1, kind: input, shape index: {}]   ;;  %s1109_s2 = inlined_call_operand.vmem [shape: f32[1,10], index: 2, kind: input, shape index: {}]   ;;  %s1110_s3 = inlined_call_operand.vmem [shape: f32[2,144,10], index: 3, kind: output, shape index: {}]  }
   0x1 LB: > { %s732_s13 = sadd.s32 4294967295, %s848_s12   ;;  %p736_p0 = scmp.ge.s32.totalorder %s848_s12, 1  ;;  %s848_s12 = sphi %s870_s12, %s13_s12  }
   0x2   : > { %p137_p1 = scmp.lt.s32.totalorder %s848_s12, 3 }
   0x4   : > { %p138_p2 = pnand %p736_p0, %p137_p1 }
   0x5   : > { %p161_p3 = scmp.lt.s32.totalorder (!%p138_p2), %s732_s13, 1 }
   0x6   : > { %141 = sbr.rel (%p138_p2) target bundleno = 298 (0x12a), region = 32 }
   0xb   : > { %vm249_vm0 = vcmask 1043456   ;;  %v786_v0 = vld [vmem:[%s1108_s1 + $0x70] sm:$0xf]  ;;  %v785_v1 = vld [vmem:[%s1108_s1 + $0x68] sm:$0xff]  ;;  %v810_v2 = vld [vmem:[%s1108_s1 + $0x98] sm:$0xf] }
   0xc   : > { %787 = vmatpush.msk.msra.mxu2 %vm249_vm0, %v786_v0  ;;  %811 = vmatpush.msk.msra.mxu3 %vm249_vm0, %v810_v2  ;;  %v193_v3 = vld [vmem:[%s1108_s1 + $0x20] sm:$0xf]  ;;  %v762_v4 = vld [vmem:[%s1108_s1 + $0x48] sm:$0xf]  ;;  %v809_v6 = vld [vmem:[%s1108_s1 + $0x90] sm:$0xff]  ;;  %s1112_s13 = smov (!%p161_p3, %s732_s13), 1 }
   0xd   : > { %v784_v5 = vld [vmem:[%s1108_s1 + $0x60] sm:$0xff]  ;;  %739 = vmatpush.msk.msra.mxu0 %vm249_vm0, %v193_v3  ;;  %763 = vmatpush.msk.msra.mxu1 %vm249_vm0, %v762_v4  ;;  %v192_v7 = vld [vmem:[%s1108_s1 + $0x18] sm:$0xff]  ;;  %v808_v9 = vld [vmem:[%s1108_s1 + $0x88] sm:$0xff]  ;;  %s832_s17 = smul.u32 144, %s1112_s13  ;;  %vm194_vm1 = vcmask 293888   ;;  %vm658_vm2 = vcmask 80896  }
   0xe   : > { %v761_v8 = vld [vmem:[%s1108_s1 + $0x40] sm:$0xff]  ;;  %443 = vmatpush.msra.mxu2 %v785_v1  ;;  %541 = vmatpush.msra.mxu3 %v809_v6  ;;  %v191_v10 = vld [vmem:[%s1108_s1 + $0x10] sm:$0xff]  ;;  %v783_v11 = vld [vmem:[%s1108_s1 + $0x58] sm:$0xff] }
   0xf   : > { %265 = vmatpush.msra.mxu0 %v192_v7  ;;  %345 = vmatpush.msra.mxu1 %v761_v8  ;;  %v760_v12 = vld [vmem:[%s1108_s1 + $0x38] sm:$0xff]  ;;  %v807_v13 = vld [vmem:[%s1108_s1 + $0x80] sm:$0xff]  ;;  %v190_v14 = vld [vmem:[%s1108_s1 + $0x8] sm:$0xff]  ;;  %s940_s28 = scalar_lea.vmem %s1107_s0, %s832_s17  ;;  %s1047_s10 = scalar_lea.vmem %s1110_s3, %s832_s17 }
  0x10   : > { %444 = vmatpush.msra.mxu2 %v784_v5  ;;  %542 = vmatpush.msra.mxu3 %v808_v9  ;;  %v759_v15 = vld [vmem:[%s1108_s1 + $0x30] sm:$0xff]  ;;  %v806_v17 = vld [vmem:[%s1108_s1 + $0x78] sm:$0xff]  ;;  %v171_v18 = vld [vmem:[%s940_s28] sm:$0xff] }
  0x11   : > { %266 = vmatpush.msra.mxu0 %v191_v10  ;;  %346 = vmatpush.msra.mxu1 %v760_v12  ;;  %v782_v16 = vld [vmem:[%s1108_s1 + $0x50] sm:$0xff]  ;;  %v189_v19 = vld [vmem:[%s1108_s1] sm:$0xff]  ;;  %v758_v20 = vld [vmem:[%s1108_s1 + $0x28] sm:$0xff] }
  0x12   : > { %445 = vmatpush.msra.mxu2 %v783_v11  ;;  %543 = vmatpush.msra.mxu3 %v807_v13  ;;  %v172_v21 = vld [vmem:[%s940_s28 + $0x8] sm:$0xff]  ;;  %v173_v22 = vld [vmem:[%s940_s28 + $0x10] sm:$0xff]  ;;  %v174_v23 = vld [vmem:[%s940_s28 + $0x18] sm:$0xff] }
  0x13   : > { %267 = vmatpush.msra.mxu0 %v190_v14  ;;  %347 = vmatpush.msra.mxu1 %v759_v15  ;;  %v175_v24 = vld [vmem:[%s940_s28 + $0x20] sm:$0xff]  ;;  %v176_v25 = vld [vmem:[%s940_s28 + $0x28] sm:$0xff]  ;;  %v177_v26 = vld [vmem:[%s940_s28 + $0x30] sm:$0xff] }
  0x14   : > { %446 = vmatpush.msra.mxu2 %v782_v16  ;;  %544 = vmatpush.msra.mxu3 %v806_v17  ;;  %v178_v27 = vld [vmem:[%s940_s28 + $0x38] sm:$0xff]  ;;  %v179_v28 = vld [vmem:[%s940_s28 + $0x40] sm:$0xff]  ;;  %v180_v29 = vld [vmem:[%s940_s28 + $0x48] sm:$0xff] }
  0x15   : > { %788 = vmatmul.msk.f32.vlgmr.msra.gmra.mxu2 %vm194_vm1, %v171_v18  ;;  %812 = vmatmul.msk.f32.vlgmr.msra.gmra.mxu3 %vm194_vm1, %v171_v18  ;;  %v181_v30 = vld [vmem:[%s940_s28 + $0x50] sm:$0xff]  ;;  %v182_v31 = vld [vmem:[%s940_s28 + $0x58] sm:$0xff]  ;;  %v183_v32 = vld [vmem:[%s940_s28 + $0x60] sm:$0xff] }
  0x16   : > { %268 = vmatpush.msra.mxu0 %v189_v19  ;;  %348 = vmatpush.msra.mxu1 %v758_v20  ;;  %v184_v33 = vld [vmem:[%s940_s28 + $0x68] sm:$0xff]  ;;  %v185_v34 = vld [vmem:[%s940_s28 + $0x70] sm:$0xff]  ;;  %v186_v35 = vld [vmem:[%s940_s28 + $0x78] sm:$0xff] }
  0x17   : > { %740 = vmatmul.msk.f32.vlgmr.msra.gmra.mxu0 %vm194_vm1, %v171_v18  ;;  %764 = vmatmul.msk.f32.vlgmr.msra.gmra.mxu1 %vm194_vm1, %v171_v18  ;;  %v187_v36 = vld [vmem:[%s940_s28 + $0x80] sm:$0xff]  ;;  %v188_v44 = vld [vmem:[%s940_s28 + $0x88] sm:$0xff] }
  0x18   : > { %v1036_v43 = vld [vmem:[%s1109_s2] ss:$0 sm:$0xff] }
  0x1d   : > { %789 = vmatmul.msk.f32.gmra.mxu2 %vm194_vm1, %v172_v21  ;;  %813 = vmatmul.msk.f32.gmra.mxu3 %vm194_vm1, %v172_v21 }
  0x1f   : > { %741 = vmatmul.msk.f32.gmra.mxu0 %vm194_vm1, %v172_v21  ;;  %765 = vmatmul.msk.f32.gmra.mxu1 %vm194_vm1, %v172_v21 }
  0x25   : > { %790 = vmatmul.msk.f32.gmra.mxu2 %vm194_vm1, %v173_v22  ;;  %814 = vmatmul.msk.f32.gmra.mxu3 %vm194_vm1, %v173_v22 }
  0x27   : > { %742 = vmatmul.msk.f32.gmra.mxu0 %vm194_vm1, %v173_v22  ;;  %766 = vmatmul.msk.f32.gmra.mxu1 %vm194_vm1, %v173_v22 }
  0x2d   : > { %791 = vmatmul.msk.f32.gmra.mxu2 %vm194_vm1, %v174_v23  ;;  %815 = vmatmul.msk.f32.gmra.mxu3 %vm194_vm1, %v174_v23 }
  0x2f   : > { %743 = vmatmul.msk.f32.gmra.mxu0 %vm194_vm1, %v174_v23  ;;  %767 = vmatmul.msk.f32.gmra.mxu1 %vm194_vm1, %v174_v23 }
  0x35   : > { %792 = vmatmul.msk.f32.gmra.mxu2 %vm194_vm1, %v175_v24  ;;  %816 = vmatmul.msk.f32.gmra.mxu3 %vm194_vm1, %v175_v24 }
  0x37   : > { %744 = vmatmul.msk.f32.gmra.mxu0 %vm194_vm1, %v175_v24  ;;  %768 = vmatmul.msk.f32.gmra.mxu1 %vm194_vm1, %v175_v24 }
  0x3d   : > { %793 = vmatmul.msk.f32.gmra.mxu2 %vm194_vm1, %v176_v25  ;;  %817 = vmatmul.msk.f32.gmra.mxu3 %vm194_vm1, %v176_v25 }
  0x3f   : > { %745 = vmatmul.msk.f32.gmra.mxu0 %vm194_vm1, %v176_v25  ;;  %769 = vmatmul.msk.f32.gmra.mxu1 %vm194_vm1, %v176_v25 }
  0x45   : > { %794 = vmatmul.msk.f32.gmra.mxu2 %vm194_vm1, %v177_v26  ;;  %818 = vmatmul.msk.f32.gmra.mxu3 %vm194_vm1, %v177_v26 }
  0x47   : > { %746 = vmatmul.msk.f32.gmra.mxu0 %vm194_vm1, %v177_v26  ;;  %770 = vmatmul.msk.f32.gmra.mxu1 %vm194_vm1, %v177_v26 }
  0x4d   : > { %795 = vmatmul.msk.f32.gmra.mxu2 %vm194_vm1, %v178_v27  ;;  %819 = vmatmul.msk.f32.gmra.mxu3 %vm194_vm1, %v178_v27 }
  0x4f   : > { %747 = vmatmul.msk.f32.gmra.mxu0 %vm194_vm1, %v178_v27  ;;  %771 = vmatmul.msk.f32.gmra.mxu1 %vm194_vm1, %v178_v27 }
  0x55   : > { %796 = vmatmul.msk.f32.gmra.mxu2 %vm194_vm1, %v179_v28  ;;  %820 = vmatmul.msk.f32.gmra.mxu3 %vm194_vm1, %v179_v28 }
  0x57   : > { %748 = vmatmul.msk.f32.gmra.mxu0 %vm194_vm1, %v179_v28  ;;  %772 = vmatmul.msk.f32.gmra.mxu1 %vm194_vm1, %v179_v28 }
  0x5d   : > { %797 = vmatmul.msk.f32.gmra.mxu2 %vm194_vm1, %v180_v29  ;;  %821 = vmatmul.msk.f32.gmra.mxu3 %vm194_vm1, %v180_v29 }
  0x5f   : > { %749 = vmatmul.msk.f32.gmra.mxu0 %vm194_vm1, %v180_v29  ;;  %773 = vmatmul.msk.f32.gmra.mxu1 %vm194_vm1, %v180_v29 }
  0x65   : > { %798 = vmatmul.msk.f32.gmra.mxu2 %vm194_vm1, %v181_v30  ;;  %822 = vmatmul.msk.f32.gmra.mxu3 %vm194_vm1, %v181_v30 }
  0x67   : > { %750 = vmatmul.msk.f32.gmra.mxu0 %vm194_vm1, %v181_v30  ;;  %774 = vmatmul.msk.f32.gmra.mxu1 %vm194_vm1, %v181_v30 }
  0x6d   : > { %799 = vmatmul.msk.f32.gmra.mxu2 %vm194_vm1, %v182_v31  ;;  %823 = vmatmul.msk.f32.gmra.mxu3 %vm194_vm1, %v182_v31 }
  0x6f   : > { %751 = vmatmul.msk.f32.gmra.mxu0 %vm194_vm1, %v182_v31  ;;  %775 = vmatmul.msk.f32.gmra.mxu1 %vm194_vm1, %v182_v31 }
  0x75   : > { %800 = vmatmul.msk.f32.gmra.mxu2 %vm194_vm1, %v183_v32  ;;  %824 = vmatmul.msk.f32.gmra.mxu3 %vm194_vm1, %v183_v32 }
  0x77   : > { %752 = vmatmul.msk.f32.gmra.mxu0 %vm194_vm1, %v183_v32  ;;  %776 = vmatmul.msk.f32.gmra.mxu1 %vm194_vm1, %v183_v32 }
  0x7d   : > { %801 = vmatmul.msk.f32.gmra.mxu2 %vm194_vm1, %v184_v33  ;;  %825 = vmatmul.msk.f32.gmra.mxu3 %vm194_vm1, %v184_v33 }
  0x7f   : > { %753 = vmatmul.msk.f32.gmra.mxu0 %vm194_vm1, %v184_v33  ;;  %777 = vmatmul.msk.f32.gmra.mxu1 %vm194_vm1, %v184_v33 }
  0x85   : > { %802 = vmatmul.msk.f32.gmra.mxu2 %vm194_vm1, %v185_v34  ;;  %826 = vmatmul.msk.f32.gmra.mxu3 %vm194_vm1, %v185_v34 }
  0x87   : > { %754 = vmatmul.msk.f32.gmra.mxu0 %vm194_vm1, %v185_v34  ;;  %778 = vmatmul.msk.f32.gmra.mxu1 %vm194_vm1, %v185_v34 }
  0x8d   : > { %803 = vmatmul.msk.f32.gmra.mxu2 %vm194_vm1, %v186_v35  ;;  %827 = vmatmul.msk.f32.gmra.mxu3 %vm194_vm1, %v186_v35 }
  0x8f   : > { %755 = vmatmul.msk.f32.gmra.mxu0 %vm194_vm1, %v186_v35  ;;  %779 = vmatmul.msk.f32.gmra.mxu1 %vm194_vm1, %v186_v35 }
  0x94   : > { %v270_v37 = vpop.f32.mrf.mxu0  ;;  %v350_v38 = vpop.f32.mrf.mxu1 }
  0x95   : > { %804 = vmatmul.msk.f32.gmra.mxu2 %vm194_vm1, %v187_v36  ;;  %v404_v39 = vmax.f32 %v270_v37, %v350_v38  ;;  %828 = vmatmul.msk.f32.gmra.mxu3 %vm194_vm1, %v187_v36 }
  0x97   : > { %756 = vmatmul.msk.f32.gmra.mxu0 %vm194_vm1, %v187_v36  ;;  %780 = vmatmul.msk.f32.gmra.mxu1 %vm194_vm1, %v187_v36 }
  0x98   : > { %v448_v40 = vpop.f32.mrf.mxu2  ;;  %v546_v41 = vpop.f32.mrf.mxu3 }
  0x99   : > { %v502_v42 = vmax.f32 %v404_v39, %v448_v40 }
  0x9b   : > { %v600_v45 = vmax.f32 %v502_v42, %v546_v41 }
  0x9c   : > { %v273_v46 = vpop.f32.mrf.mxu0  ;;  %v353_v47 = vpop.f32.mrf.mxu1 }
  0x9d   : > { %v622_v48 = vadd.f32 %v1036_v43, %v600_v45  ;;  %805 = vmatmul.msk.f32.gmra.mxu2 %vm194_vm1, %v188_v44  ;;  %v405_v49 = vmax.f32 %v273_v46, %v353_v47  ;;  %829 = vmatmul.msk.f32.gmra.mxu3 %vm194_vm1, %v188_v44 }
  0x9f   : > { %v640_v50 = vmax.f32 %v622_v48, 0.0  ;;  %757 = vmatmul.msk.f32.gmra.mxu0 %vm194_vm1, %v188_v44  ;;  %781 = vmatmul.msk.f32.gmra.mxu1 %vm194_vm1, %v188_v44 }
  0xa0   : > { %v451_v51 = vpop.f32.mrf.mxu2  ;;  %v549_v52 = vpop.f32.mrf.mxu3 }
  0xa1   : > { %659 = vst.msk [vmem:[%s1047_s10] sm:$0xff] %vm658_vm2, %v640_v50  ;;  %v503_v53 = vmax.f32 %v405_v49, %v451_v51 }
  0xa3   : > { %v601_v54 = vmax.f32 %v503_v53, %v549_v52 }
  0xa4   : > { %v276_v55 = vpop.f32.mrf.mxu0  ;;  %v356_v56 = vpop.f32.mrf.mxu1 }
  0xa5   : > { %v623_v57 = vadd.f32 %v1036_v43, %v601_v54  ;;  %v406_v58 = vmax.f32 %v276_v55, %v356_v56 }
  0xa7   : > { %v641_v59 = vmax.f32 %v623_v57, 0.0 }
  0xa8   : > { %v454_v60 = vpop.f32.mrf.mxu2  ;;  %v552_v61 = vpop.f32.mrf.mxu3 }
  0xa9   : > { %660 = vst.msk [vmem:[%s1047_s10 + $0x8] sm:$0xff] %vm658_vm2, %v641_v59  ;;  %v504_v62 = vmax.f32 %v406_v58, %v454_v60 }
  0xab   : > { %v602_v63 = vmax.f32 %v504_v62, %v552_v61 }
  0xac   : > { %v279_v0 = vpop.f32.mrf.mxu0  ;;  %v359_v1 = vpop.f32.mrf.mxu1 }
  0xad   : > { %v624_v2 = vadd.f32 %v1036_v43, %v602_v63  ;;  %v407_v3 = vmax.f32 %v279_v0, %v359_v1 }
  0xaf   : > { %v642_v4 = vmax.f32 %v624_v2, 0.0 }
  0xb0   : > { %v457_v5 = vpop.f32.mrf.mxu2  ;;  %v555_v6 = vpop.f32.mrf.mxu3 }
  0xb1   : > { %661 = vst.msk [vmem:[%s1047_s10 + $0x10] sm:$0xff] %vm658_vm2, %v642_v4  ;;  %v505_v7 = vmax.f32 %v407_v3, %v457_v5 }
  0xb3   : > { %v603_v8 = vmax.f32 %v505_v7, %v555_v6 }
  0xb4   : > { %v282_v9 = vpop.f32.mrf.mxu0  ;;  %v362_v10 = vpop.f32.mrf.mxu1 }
  0xb5   : > { %v625_v11 = vadd.f32 %v1036_v43, %v603_v8  ;;  %v408_v12 = vmax.f32 %v282_v9, %v362_v10 }
  0xb7   : > { %v643_v13 = vmax.f32 %v625_v11, 0.0 }
  0xb8   : > { %v460_v14 = vpop.f32.mrf.mxu2  ;;  %v558_v15 = vpop.f32.mrf.mxu3 }
  0xb9   : > { %662 = vst.msk [vmem:[%s1047_s10 + $0x18] sm:$0xff] %vm658_vm2, %v643_v13  ;;  %v506_v16 = vmax.f32 %v408_v12, %v460_v14 }
  0xbb   : > { %v604_v17 = vmax.f32 %v506_v16, %v558_v15 }
  0xbc   : > { %v285_v18 = vpop.f32.mrf.mxu0  ;;  %v365_v19 = vpop.f32.mrf.mxu1 }
  0xbd   : > { %v626_v20 = vadd.f32 %v1036_v43, %v604_v17  ;;  %v409_v21 = vmax.f32 %v285_v18, %v365_v19 }
  0xbf   : > { %v644_v22 = vmax.f32 %v626_v20, 0.0 }
  0xc0   : > { %v463_v23 = vpop.f32.mrf.mxu2  ;;  %v561_v24 = vpop.f32.mrf.mxu3 }
  0xc1   : > { %663 = vst.msk [vmem:[%s1047_s10 + $0x20] sm:$0xff] %vm658_vm2, %v644_v22  ;;  %v507_v25 = vmax.f32 %v409_v21, %v463_v23 }
  0xc3   : > { %v605_v26 = vmax.f32 %v507_v25, %v561_v24 }
  0xc4   : > { %v288_v27 = vpop.f32.mrf.mxu0  ;;  %v368_v28 = vpop.f32.mrf.mxu1 }
  0xc5   : > { %v627_v29 = vadd.f32 %v1036_v43, %v605_v26  ;;  %v410_v30 = vmax.f32 %v288_v27, %v368_v28 }
  0xc7   : > { %v645_v31 = vmax.f32 %v627_v29, 0.0 }
  0xc8   : > { %v466_v32 = vpop.f32.mrf.mxu2  ;;  %v564_v33 = vpop.f32.mrf.mxu3 }
  0xc9   : > { %664 = vst.msk [vmem:[%s1047_s10 + $0x28] sm:$0xff] %vm658_vm2, %v645_v31  ;;  %v508_v34 = vmax.f32 %v410_v30, %v466_v32 }
  0xcb   : > { %v606_v35 = vmax.f32 %v508_v34, %v564_v33 }
  0xcc   : > { %v291_v36 = vpop.f32.mrf.mxu0  ;;  %v371_v37 = vpop.f32.mrf.mxu1 }
  0xcd   : > { %v628_v38 = vadd.f32 %v1036_v43, %v606_v35  ;;  %v411_v39 = vmax.f32 %v291_v36, %v371_v37 }
  0xcf   : > { %v646_v40 = vmax.f32 %v628_v38, 0.0 }
  0xd0   : > { %v469_v41 = vpop.f32.mrf.mxu2  ;;  %v567_v42 = vpop.f32.mrf.mxu3 }
  0xd1   : > { %665 = vst.msk [vmem:[%s1047_s10 + $0x30] sm:$0xff] %vm658_vm2, %v646_v40  ;;  %v509_v44 = vmax.f32 %v411_v39, %v469_v41 }
  0xd3   : > { %v607_v45 = vmax.f32 %v509_v44, %v567_v42 }
  0xd4   : > { %v294_v46 = vpop.f32.mrf.mxu0  ;;  %v374_v47 = vpop.f32.mrf.mxu1 }
  0xd5   : > { %v629_v48 = vadd.f32 %v1036_v43, %v607_v45  ;;  %v412_v49 = vmax.f32 %v294_v46, %v374_v47 }
  0xd7   : > { %v647_v50 = vmax.f32 %v629_v48, 0.0 }
  0xd8   : > { %v472_v51 = vpop.f32.mrf.mxu2  ;;  %v570_v52 = vpop.f32.mrf.mxu3 }
  0xd9   : > { %666 = vst.msk [vmem:[%s1047_s10 + $0x38] sm:$0xff] %vm658_vm2, %v647_v50  ;;  %v510_v53 = vmax.f32 %v412_v49, %v472_v51 }
  0xdb   : > { %v608_v54 = vmax.f32 %v510_v53, %v570_v52 }
  0xdc   : > { %v297_v55 = vpop.f32.mrf.mxu0  ;;  %v377_v56 = vpop.f32.mrf.mxu1 }
  0xdd   : > { %v630_v57 = vadd.f32 %v1036_v43, %v608_v54  ;;  %v413_v58 = vmax.f32 %v297_v55, %v377_v56 }
  0xdf   : > { %v648_v59 = vmax.f32 %v630_v57, 0.0 }
  0xe0   : > { %v475_v60 = vpop.f32.mrf.mxu2  ;;  %v573_v61 = vpop.f32.mrf.mxu3 }
  0xe1   : > { %667 = vst.msk [vmem:[%s1047_s10 + $0x40] sm:$0xff] %vm658_vm2, %v648_v59  ;;  %v511_v62 = vmax.f32 %v413_v58, %v475_v60 }
  0xe3   : > { %v609_v63 = vmax.f32 %v511_v62, %v573_v61 }
  0xe4   : > { %v300_v0 = vpop.f32.mrf.mxu0  ;;  %v380_v1 = vpop.f32.mrf.mxu1 }
  0xe5   : > { %v631_v2 = vadd.f32 %v1036_v43, %v609_v63  ;;  %v414_v3 = vmax.f32 %v300_v0, %v380_v1 }
  0xe7   : > { %v649_v4 = vmax.f32 %v631_v2, 0.0 }
  0xe8   : > { %v478_v5 = vpop.f32.mrf.mxu2  ;;  %v576_v6 = vpop.f32.mrf.mxu3 }
  0xe9   : > { %668 = vst.msk [vmem:[%s1047_s10 + $0x48] sm:$0xff] %vm658_vm2, %v649_v4  ;;  %v512_v7 = vmax.f32 %v414_v3, %v478_v5 }
  0xeb   : > { %v610_v8 = vmax.f32 %v512_v7, %v576_v6 }
  0xec   : > { %v303_v9 = vpop.f32.mrf.mxu0  ;;  %v383_v10 = vpop.f32.mrf.mxu1 }
  0xed   : > { %v632_v11 = vadd.f32 %v1036_v43, %v610_v8  ;;  %v415_v12 = vmax.f32 %v303_v9, %v383_v10 }
  0xef   : > { %v650_v13 = vmax.f32 %v632_v11, 0.0 }
  0xf0   : > { %v481_v14 = vpop.f32.mrf.mxu2  ;;  %v579_v15 = vpop.f32.mrf.mxu3 }
  0xf1   : > { %669 = vst.msk [vmem:[%s1047_s10 + $0x50] sm:$0xff] %vm658_vm2, %v650_v13  ;;  %v513_v16 = vmax.f32 %v415_v12, %v481_v14 }
  0xf3   : > { %v611_v17 = vmax.f32 %v513_v16, %v579_v15 }
  0xf4   : > { %v306_v18 = vpop.f32.mrf.mxu0  ;;  %v386_v19 = vpop.f32.mrf.mxu1 }
  0xf5   : > { %v633_v20 = vadd.f32 %v1036_v43, %v611_v17  ;;  %v416_v21 = vmax.f32 %v306_v18, %v386_v19 }
  0xf7   : > { %v651_v22 = vmax.f32 %v633_v20, 0.0 }
  0xf8   : > { %v484_v23 = vpop.f32.mrf.mxu2  ;;  %v582_v24 = vpop.f32.mrf.mxu3 }
  0xf9   : > { %670 = vst.msk [vmem:[%s1047_s10 + $0x58] sm:$0xff] %vm658_vm2, %v651_v22  ;;  %v514_v25 = vmax.f32 %v416_v21, %v484_v23 }
  0xfb   : > { %v612_v26 = vmax.f32 %v514_v25, %v582_v24 }
  0xfc   : > { %v309_v27 = vpop.f32.mrf.mxu0  ;;  %v389_v28 = vpop.f32.mrf.mxu1 }
  0xfd   : > { %v634_v29 = vadd.f32 %v1036_v43, %v612_v26  ;;  %v417_v30 = vmax.f32 %v309_v27, %v389_v28 }
  0xff   : > { %v652_v31 = vmax.f32 %v634_v29, 0.0 }
 0x100   : > { %v487_v32 = vpop.f32.mrf.mxu2  ;;  %v585_v33 = vpop.f32.mrf.mxu3 }
 0x101   : > { %671 = vst.msk [vmem:[%s1047_s10 + $0x60] sm:$0xff] %vm658_vm2, %v652_v31  ;;  %v515_v34 = vmax.f32 %v417_v30, %v487_v32 }
 0x103   : > { %v613_v35 = vmax.f32 %v515_v34, %v585_v33 }
 0x104   : > { %v312_v36 = vpop.f32.mrf.mxu0  ;;  %v392_v37 = vpop.f32.mrf.mxu1 }
 0x105   : > { %v635_v38 = vadd.f32 %v1036_v43, %v613_v35  ;;  %v418_v39 = vmax.f32 %v312_v36, %v392_v37 }
 0x107   : > { %v653_v40 = vmax.f32 %v635_v38, 0.0 }
 0x108   : > { %v490_v41 = vpop.f32.mrf.mxu2  ;;  %v588_v42 = vpop.f32.mrf.mxu3 }
 0x109   : > { %672 = vst.msk [vmem:[%s1047_s10 + $0x68] sm:$0xff] %vm658_vm2, %v653_v40  ;;  %v516_v44 = vmax.f32 %v418_v39, %v490_v41 }
 0x10b   : > { %v614_v45 = vmax.f32 %v516_v44, %v588_v42 }
 0x10c   : > { %v315_v46 = vpop.f32.mrf.mxu0  ;;  %v395_v47 = vpop.f32.mrf.mxu1 }
 0x10d   : > { %v636_v48 = vadd.f32 %v1036_v43, %v614_v45  ;;  %v419_v49 = vmax.f32 %v315_v46, %v395_v47 }
 0x10f   : > { %v654_v50 = vmax.f32 %v636_v48, 0.0 }
 0x110   : > { %v493_v51 = vpop.f32.mrf.mxu2  ;;  %v591_v52 = vpop.f32.mrf.mxu3 }
 0x111   : > { %673 = vst.msk [vmem:[%s1047_s10 + $0x70] sm:$0xff] %vm658_vm2, %v654_v50  ;;  %v517_v53 = vmax.f32 %v419_v49, %v493_v51 }
 0x113   : > { %v615_v54 = vmax.f32 %v517_v53, %v591_v52 }
 0x114   : > { %v318_v55 = vpop.f32.mrf.mxu0  ;;  %v398_v56 = vpop.f32.mrf.mxu1 }
 0x115   : > { %v637_v57 = vadd.f32 %v1036_v43, %v615_v54  ;;  %v420_v58 = vmax.f32 %v318_v55, %v398_v56 }
 0x117   : > { %v655_v59 = vmax.f32 %v637_v57, 0.0 }
 0x118   : > { %v496_v60 = vpop.f32.mrf.mxu2  ;;  %v594_v61 = vpop.f32.mrf.mxu3 }
 0x119   : > { %674 = vst.msk [vmem:[%s1047_s10 + $0x78] sm:$0xff] %vm658_vm2, %v655_v59  ;;  %v518_v62 = vmax.f32 %v420_v58, %v496_v60 }
 0x11b   : > { %v616_v63 = vmax.f32 %v518_v62, %v594_v61 }
 0x11c   : > { %v321_v0 = vpop.f32.mrf.mxu0  ;;  %v401_v1 = vpop.f32.mrf.mxu1 }
 0x11d   : > { %v638_v2 = vadd.f32 %v1036_v43, %v616_v63  ;;  %v421_v3 = vmax.f32 %v321_v0, %v401_v1 }
 0x11f   : > { %v656_v4 = vmax.f32 %v638_v2, 0.0 }
 0x120   : > { %v499_v5 = vpop.f32.mrf.mxu2  ;;  %v597_v6 = vpop.f32.mrf.mxu3 }
 0x121   : > { %675 = vst.msk [vmem:[%s1047_s10 + $0x80] sm:$0xff] %vm658_vm2, %v656_v4  ;;  %v519_v7 = vmax.f32 %v421_v3, %v499_v5 }
 0x123   : > { %v617_v8 = vmax.f32 %v519_v7, %v597_v6 }
 0x125   : > { %v639_v9 = vadd.f32 %v1036_v43, %v617_v8 }
 0x127   : > { %v657_v10 = vmax.f32 %v639_v9, 0.0 }
 0x129   : > { %676 = vst.msk [vmem:[%s1047_s10 + $0x88] sm:$0xff] %vm658_vm2, %v657_v10 }
 0x12a PF: > { %s13_s12 = sadd.s32 1, %s848_s12  }
 0x12b   : > { %p10_p4 = scmp.ge.s32.totalorder %s13_s12, 4  }
 0x12d   :  { %12 = sbr.rel (!%p10_p4) target bundleno = 1 (0x1), region = 65 }

// kernel: _lambda_.3
= control target key start
LH: loop header
LB: loop body
LE: loop exit
PB: predicated region body
PF: predicated region fallthrough
CT: control target
= control target key end

     0   :  { %12 = vsyncpa [#allocation3], 0  ;;  %s2676_s0 = inlined_call_operand.vmem [shape: f32[2,16,360], index: 0, kind: input, shape index: {}]   ;;  %s2677_s1 = inlined_call_operand.vmem [shape: f32[4,360,20], index: 1, kind: input, shape index: {}]   ;;  %s2678_s2 = inlined_call_operand.vmem [shape: f32[1,20], index: 2, kind: input, shape index: {}]   ;;  %s2679_s3 = inlined_call_operand.vmem [shape: f32[16,20,50], index: 3, kind: input, shape index: {}]   ;;  %s2680_s4 = inlined_call_operand.vmem [shape: f32[1,50], index: 4, kind: input, shape index: {}]   ;;  %s2681_s5 = inlined_call_operand.vmem [shape: f32[50,10], index: 5, kind: input, shape index: {}]   ;;  %s2682_s6 = inlined_call_operand.vmem [shape: f32[1,10], index: 6, kind: input, shape index: {}]   ;;  %s2683_s7 = inlined_call_operand.hbm [shape: f32[2,1,10], index: 7, kind: output, shape index: {}]  }
   0x1   :  { %14 = vsyncpa [#allocation3 + $0x1], 0  ;;  %s1757_s24 = smov 0   ;;  %s1759_s25 = smov 0  }
   0x2   :  { %s1761_s26 = smov 0   ;;  %s1763_s27 = smov 0  }
   0x3 LB: > { %s1778_s28 = sadd.s32 4294967295, %s1715_s27   ;;  %s1379_s29 = sadd.s32 4294967294, %s1715_s27   ;;  %s1715_s27 = sphi %s1763_s27, %s2689_s27   ;;  %s1711_s26 = sphi %s1761_s26, %s2688_s26   ;;  %s1707_s25 = sphi %s1759_s25, %s2687_s25   ;;  %s1703_s24 = sphi %s1757_s24, %s2686_s24  }
   0x4   : > { %s1782_s30 = sadd.s32 1, %s1715_s27   ;;  %s179_s8 = sadd.s32 1, %s1711_s26 }
   0x5   : > { %s176_s9 = ssub.s32 %s1715_s27, %s1782_s30  ;;  %p189_p0 = scmp.ne.s32.totalorder %s1711_s26, %s1707_s25 }
   0x6   : > { %p177_p1 = scmp.eq.s32.totalorder %s176_s9, 0  ;;  %p190_p2 = scmp.eq.s32.totalorder %s1778_s28, 1 }
   0x7   : > { %p195_p3 = scmp.ne.s32.totalorder %s1707_s25, %s1703_s24  ;;  %p196_p4 = scmp.eq.s32.totalorder %s1379_s29, 1 }
   0x8   : > { %s1793_s10 = scalar_select %p177_p1, %s1711_s26, %s179_s8  }
   0x9   : > { %p1795_p5 = por %p190_p2, %p189_p0  ;;  %p1799_p6 = por %p196_p4, %p195_p3 }
   0xa   : > { %p1382_p7 = scmp.ge.s32.totalorder %s1715_s27, 1  ;;  %p240_p8 = scmp.lt.s32.totalorder %s1715_s27, 3 }
   0xc   : > { %p241_p9 = pnand %p1382_p7, %p240_p8 }
   0xd   : > { %p271_p10 = scmp.lt.s32.totalorder (!%p241_p9), %s1778_s28, 1  ;;  %s1320_s16 = scalar_lea.hbm (!%p241_p9), %s2683_s7, %s1778_s28 }
   0xe   : > { %244 = sbr.rel (%p241_p9) target bundleno = 822 (0x336), region = 48  ;;  %s1324_s19 = sshll.u32 (!%p241_p9), %s1320_s16, 4  ;;  %s1325_s19 = int_to_ptr.hbm [resolvable:$true] %s1324_s19 }
   0xf   : > { %s1667_s21 = sshra.s32 (!%p241_p9), %s1325_s19, 4  ;;  %s1673_s8 = scalar_lea.hbm (!%p241_p9), %s2683_s7, 2  ;;  %s1668_s21 = int_to_ptr.hbm [resolvable:$true] %s1667_s21 }
  0x10   : > { %s1669_s22 = scalar_lea.hbm (!%p241_p9), %s1668_s21, 1  ;;  %p1674_p0 = scmp.lt.s32.totalorder (!%p241_p9), %s1668_s21, %s2683_s7 }
  0x11   : > { %p1670_p11 = scmp.ne.s32.totalorder (!%p241_p9), %s1668_s21, %s1669_s22  ;;  %p1675_p1 = scmp.lt.s32.totalorder (!%p241_p9), %s1673_s8, %s1669_s22 }
  0x13   : > { %v297_v0 = vld [vmem:[%s2677_s1 + $0x78] sm:$0xff]  ;;  %v326_v2 = vld [vmem:[%s2677_s1 + $0x160] sm:$0xff]  ;;  %v296_v3 = vld [vmem:[%s2677_s1 + $0x70] sm:$0xff]  ;;  %s1998_s13 = scalar_select %p271_p10, %s1778_s28, 1  ;;  %vm327_vm0 = vcmask 850944   ;;  %vm774_vm1 = vcmask 1043456  }
  0x14   : > { %v313_v1 = vld [vmem:[%s2677_s1 + $0xf8] sm:$0xff]  ;;  %334 = vmatpush.msra.mxu0 %v297_v0  ;;  %v312_v4 = vld [vmem:[%s2677_s1 + $0xf0] sm:$0xff]  ;;  %383 = vmatpush.msra.mxu2 %v326_v2  ;;  %v1401_v6 = vld [vmem:[%s2677_s1 + $0x1e0] sm:$0xff]  ;;  %vm771_vm2 = vcmask 162816   ;;  %vm1272_vm3 = vcmask 1041408   ;;  %vm1268_vm4 = vcmask 408576   ;;  %p1671_p12 = pnand %p1670_p11, %p1795_p5  ;;  %p1676_p2 = por %p1675_p1, %p1674_p0 }
  0x15   : > { %357 = vmatpush.msra.mxu1 %v313_v1  ;;  %v325_v5 = vld [vmem:[%s2677_s1 + $0x158] sm:$0xff]  ;;  %v295_v7 = vld [vmem:[%s2677_s1 + $0x68] sm:$0xff]  ;;  %v324_v9 = vld [vmem:[%s2677_s1 + $0x150] sm:$0xff]  ;;  %449 = vmatpush.msra.mxu3 %v1401_v6  ;;  %s1608_s17 = smul.u32 48, %s1998_s13  ;;  %vm1296_vm5 = vcmask 73728  }
  0x16   : > { %v311_v8 = vld [vmem:[%s2677_s1 + $0xe8] sm:$0xff]  ;;  %335 = vmatpush.msra.mxu0 %v296_v3  ;;  %v1400_v10 = vld [vmem:[%s2677_s1 + $0x1d8] sm:$0xff]  ;;  %384 = vmatpush.msra.mxu2 %v325_v5  ;;  %v294_v11 = vld [vmem:[%s2677_s1 + $0x60] sm:$0xff]  ;;  %p1672_p13 = pneg %p1671_p12 }
  0x17   : > { %358 = vmatpush.msra.mxu1 %v312_v4  ;;  %v310_v12 = vld [vmem:[%s2677_s1 + $0xe0] sm:$0xff]  ;;  %v323_v13 = vld [vmem:[%s2677_s1 + $0x148] sm:$0xff]  ;;  %v1399_v14 = vld [vmem:[%s2677_s1 + $0x1d0] sm:$0xff]  ;;  %450 = vmatpush.msra.mxu3 %v1400_v10  ;;  %s2052_s23 = scalar_lea.vmem %s2676_s0, %s1608_s17 }
  0x18   : > { %336 = vmatpush.msra.mxu0 %v295_v7  ;;  %385 = vmatpush.msra.mxu2 %v324_v9  ;;  %v293_v15 = vld [vmem:[%s2677_s1 + $0x58] sm:$0xff]  ;;  %v322_v17 = vld [vmem:[%s2677_s1 + $0x140] sm:$0xff]  ;;  %v1398_v18 = vld [vmem:[%s2677_s1 + $0x1c8] sm:$0xff]  ;;  %p1677_p3 = pnand %p1676_p2, %p1672_p13 }
  0x19   : > { %359 = vmatpush.msra.mxu1 %v311_v8  ;;  %v309_v16 = vld [vmem:[%s2677_s1 + $0xd8] sm:$0xff]  ;;  %451 = vmatpush.msra.mxu3 %v1399_v14  ;;  %v292_v19 = vld [vmem:[%s2677_s1 + $0x50] sm:$0xff]  ;;  %v1397_v22 = vld [vmem:[%s2677_s1 + $0x1c0] sm:$0xff] }
  0x1a   : > { %337 = vmatpush.msra.mxu0 %v294_v11  ;;  %386 = vmatpush.msra.mxu2 %v323_v13  ;;  %v308_v20 = vld [vmem:[%s2677_s1 + $0xd0] sm:$0xff]  ;;  %v321_v21 = vld [vmem:[%s2677_s1 + $0x138] sm:$0xff]  ;;  %v291_v23 = vld [vmem:[%s2677_s1 + $0x48] sm:$0xff] }
  0x1b   : > { %360 = vmatpush.msra.mxu1 %v310_v12  ;;  %452 = vmatpush.msra.mxu3 %v1398_v18  ;;  %v307_v24 = vld [vmem:[%s2677_s1 + $0xc8] sm:$0xff]  ;;  %v320_v25 = vld [vmem:[%s2677_s1 + $0x130] sm:$0xff]  ;;  %v1396_v26 = vld [vmem:[%s2677_s1 + $0x1b8] sm:$0xff] }
  0x1c   : > { %338 = vmatpush.msra.mxu0 %v293_v15  ;;  %387 = vmatpush.msra.mxu2 %v322_v17  ;;  %v290_v27 = vld [vmem:[%s2677_s1 + $0x40] sm:$0xff]  ;;  %v319_v29 = vld [vmem:[%s2677_s1 + $0x128] sm:$0xff]  ;;  %v1395_v30 = vld [vmem:[%s2677_s1 + $0x1b0] sm:$0xff] }
  0x1d   : > { %361 = vmatpush.msra.mxu1 %v309_v16  ;;  %453 = vmatpush.msra.mxu3 %v1397_v22  ;;  %v306_v28 = vld [vmem:[%s2677_s1 + $0xc0] sm:$0xff]  ;;  %v289_v31 = vld [vmem:[%s2677_s1 + $0x38] sm:$0xff]  ;;  %v1394_v34 = vld [vmem:[%s2677_s1 + $0x1a8] sm:$0xff] }
  0x1e   : > { %339 = vmatpush.msra.mxu0 %v292_v19  ;;  %388 = vmatpush.msra.mxu2 %v321_v21  ;;  %v305_v32 = vld [vmem:[%s2677_s1 + $0xb8] sm:$0xff]  ;;  %v318_v33 = vld [vmem:[%s2677_s1 + $0x120] sm:$0xff]  ;;  %v288_v35 = vld [vmem:[%s2677_s1 + $0x30] sm:$0xff] }
  0x1f   : > { %362 = vmatpush.msra.mxu1 %v308_v20  ;;  %454 = vmatpush.msra.mxu3 %v1396_v26  ;;  %v304_v36 = vld [vmem:[%s2677_s1 + $0xb0] sm:$0xff]  ;;  %v317_v37 = vld [vmem:[%s2677_s1 + $0x118] sm:$0xff]  ;;  %v1393_v38 = vld [vmem:[%s2677_s1 + $0x1a0] sm:$0xff] }
  0x20   : > { %340 = vmatpush.msra.mxu0 %v291_v23  ;;  %389 = vmatpush.msra.mxu2 %v320_v25  ;;  %v287_v39 = vld [vmem:[%s2677_s1 + $0x28] sm:$0xff]  ;;  %v316_v41 = vld [vmem:[%s2677_s1 + $0x110] sm:$0xff]  ;;  %v1392_v42 = vld [vmem:[%s2677_s1 + $0x198] sm:$0xff] }
  0x21   : > { %363 = vmatpush.msra.mxu1 %v307_v24  ;;  %455 = vmatpush.msra.mxu3 %v1395_v30  ;;  %v303_v40 = vld [vmem:[%s2677_s1 + $0xa8] sm:$0xff]  ;;  %v286_v43 = vld [vmem:[%s2677_s1 + $0x20] sm:$0xff]  ;;  %v1391_v46 = vld [vmem:[%s2677_s1 + $0x190] sm:$0xff] }
  0x22   : > { %341 = vmatpush.msra.mxu0 %v290_v27  ;;  %390 = vmatpush.msra.mxu2 %v319_v29  ;;  %v302_v44 = vld [vmem:[%s2677_s1 + $0xa0] sm:$0xff]  ;;  %v315_v45 = vld [vmem:[%s2677_s1 + $0x108] sm:$0xff]  ;;  %v285_v47 = vld [vmem:[%s2677_s1 + $0x18] sm:$0xff] }
  0x23   : > { %364 = vmatpush.msra.mxu1 %v306_v28  ;;  %456 = vmatpush.msra.mxu3 %v1394_v34  ;;  %v301_v48 = vld [vmem:[%s2677_s1 + $0x98] sm:$0xff]  ;;  %v314_v49 = vld [vmem:[%s2677_s1 + $0x100] sm:$0xff]  ;;  %v1390_v50 = vld [vmem:[%s2677_s1 + $0x188] sm:$0xff] }
  0x24   : > { %342 = vmatpush.msra.mxu0 %v289_v31  ;;  %391 = vmatpush.msra.mxu2 %v318_v33  ;;  %v1417_v51 = vld [vmem:[%s2677_s1 + $0x260] sm:$0xff]  ;;  %v284_v52 = vld [vmem:[%s2677_s1 + $0x10] sm:$0xff]  ;;  %v1416_v55 = vld [vmem:[%s2677_s1 + $0x258] sm:$0xff] }
  0x25   : > { %365 = vmatpush.msra.mxu1 %v305_v32  ;;  %457 = vmatpush.msra.mxu3 %v1393_v38  ;;  %v300_v53 = vld [vmem:[%s2677_s1 + $0x90] sm:$0xff]  ;;  %v1389_v54 = vld [vmem:[%s2677_s1 + $0x180] sm:$0xff]  ;;  %v283_v56 = vld [vmem:[%s2677_s1 + $0x8] sm:$0xff] }
  0x26   : > { %343 = vmatpush.msra.mxu0 %v288_v35  ;;  %392 = vmatpush.msra.mxu2 %v317_v37  ;;  %v299_v57 = vld [vmem:[%s2677_s1 + $0x88] sm:$0xff]  ;;  %v1388_v58 = vld [vmem:[%s2677_s1 + $0x178] sm:$0xff]  ;;  %v1415_v59 = vld [vmem:[%s2677_s1 + $0x250] sm:$0xff] }
  0x27   : > { %366 = vmatpush.msra.mxu1 %v304_v36  ;;  %458 = vmatpush.msra.mxu3 %v1392_v42  ;;  %v282_v60 = vld [vmem:[%s2677_s1] sm:$0xff]  ;;  %v1387_v62 = vld [vmem:[%s2677_s1 + $0x170] sm:$0xff]  ;;  %v1414_v63 = vld [vmem:[%s2677_s1 + $0x248] sm:$0xff] }
  0x28   : > { %344 = vmatpush.msra.mxu0 %v287_v39  ;;  %393 = vmatpush.msra.mxu2 %v316_v41  ;;  %v298_v61 = vld [vmem:[%s2677_s1 + $0x80] sm:$0xff]  ;;  %v1430_v0 = vld [vmem:[%s2677_s1 + $0x2c8] sm:$0xff]  ;;  %v1412_v7 = vld [vmem:[%s2677_s1 + $0x238] sm:$0xff] }
  0x29   : > { %367 = vmatpush.msra.mxu1 %v303_v40  ;;  %459 = vmatpush.msra.mxu3 %v1391_v46  ;;  %v1448_v1 = vld [vmem:[%s2677_s1 + $0x348] sm:$0xff]  ;;  %v1413_v3 = vld [vmem:[%s2677_s1 + $0x240] sm:$0xff]  ;;  %v1428_v8 = vld [vmem:[%s2677_s1 + $0x2b8] sm:$0xff] }
  0x2a   : > { %345 = vmatpush.msra.mxu0 %v286_v43  ;;  %394 = vmatpush.msra.mxu2 %v315_v45  ;;  %v1386_v2 = vld [vmem:[%s2677_s1 + $0x168] sm:$0xff]  ;;  %v1429_v4 = vld [vmem:[%s2677_s1 + $0x2c0] sm:$0xff]  ;;  %v1446_v9 = vld [vmem:[%s2677_s1 + $0x338] sm:$0xff] }
  0x2b   : > { %368 = vmatpush.msra.mxu1 %v302_v44  ;;  %460 = vmatpush.msra.mxu3 %v1390_v50  ;;  %v1447_v5 = vld [vmem:[%s2677_s1 + $0x340] sm:$0xff]  ;;  %v1464_v6 = vld [vmem:[%s2677_s1 + $0x3c8] sm:$0xff]  ;;  %v1411_v11 = vld [vmem:[%s2677_s1 + $0x230] sm:$0xff] }
  0x2c   : > { %346 = vmatpush.msra.mxu0 %v285_v47  ;;  %395 = vmatpush.msra.mxu2 %v314_v49  ;;  %v1463_v10 = vld [vmem:[%s2677_s1 + $0x3c0] sm:$0xff]  ;;  %v1427_v12 = vld [vmem:[%s2677_s1 + $0x2b0] sm:$0xff]  ;;  %v1462_v14 = vld [vmem:[%s2677_s1 + $0x3b8] sm:$0xff] }
  0x2d   : > { %369 = vmatpush.msra.mxu1 %v301_v48  ;;  %461 = vmatpush.msra.mxu3 %v1389_v54  ;;  %v1445_v13 = vld [vmem:[%s2677_s1 + $0x330] sm:$0xff]  ;;  %v1410_v15 = vld [vmem:[%s2677_s1 + $0x228] sm:$0xff]  ;;  %v1425_v20 = vld [vmem:[%s2677_s1 + $0x2a0] sm:$0xff] }
  0x2e   : > { %472 = vmatpush.msrb.mxu2 %v1417_v51  ;;  %347 = vmatpush.msra.mxu0 %v284_v52  ;;  %v1426_v16 = vld [vmem:[%s2677_s1 + $0x2a8] sm:$0xff]  ;;  %v1461_v18 = vld [vmem:[%s2677_s1 + $0x3b0] sm:$0xff]  ;;  %v1409_v21 = vld [vmem:[%s2677_s1 + $0x220] sm:$0xff] }
  0x2f   : > { %370 = vmatpush.msra.mxu1 %v300_v53  ;;  %462 = vmatpush.msra.mxu3 %v1388_v58  ;;  %v1444_v17 = vld [vmem:[%s2677_s1 + $0x328] sm:$0xff]  ;;  %v2067_v19 = vld [vmem:[%s2052_s23 + $0x10] sm:$0xff]  ;;  %v1443_v22 = vld [vmem:[%s2677_s1 + $0x320] sm:$0xff] }
  0x30   : > { %473 = vmatpush.msrb.mxu2 %v1416_v55  ;;  %348 = vmatpush.msra.mxu0 %v283_v56  ;;  %v1460_v23 = vld [vmem:[%s2677_s1 + $0x3a8] sm:$0xff]  ;;  %v1424_v24 = vld [vmem:[%s2677_s1 + $0x298] sm:$0xff]  ;;  %v1459_v27 = vld [vmem:[%s2677_s1 + $0x3a0] sm:$0xff] }
  0x31   : > { %371 = vmatpush.msra.mxu1 %v299_v57  ;;  %463 = vmatpush.msra.mxu3 %v1387_v62  ;;  %v1408_v25 = vld [vmem:[%s2677_s1 + $0x218] sm:$0xff]  ;;  %v1423_v28 = vld [vmem:[%s2677_s1 + $0x290] sm:$0xff]  ;;  %v1422_v32 = vld [vmem:[%s2677_s1 + $0x288] sm:$0xff] }
  0x32   : > { %474 = vmatpush.msrb.mxu2 %v1415_v59  ;;  %349 = vmatpush.msra.mxu0 %v282_v60  ;;  %v1442_v26 = vld [vmem:[%s2677_s1 + $0x318] sm:$0xff]  ;;  %v1407_v29 = vld [vmem:[%s2677_s1 + $0x210] sm:$0xff]  ;;  %v1406_v33 = vld [vmem:[%s2677_s1 + $0x208] sm:$0xff] }
  0x33   : > { %372 = vmatpush.msra.mxu1 %v298_v61  ;;  %464 = vmatpush.msra.mxu3 %v1386_v2  ;;  %v1441_v30 = vld [vmem:[%s2677_s1 + $0x310] sm:$0xff]  ;;  %v1458_v31 = vld [vmem:[%s2677_s1 + $0x398] sm:$0xff]  ;;  %v1440_v34 = vld [vmem:[%s2677_s1 + $0x308] sm:$0xff] }
  0x34   : > { %475 = vmatpush.msrb.mxu2 %v1414_v63  ;;  %498 = vmatpush.msrb.mxu0 %v1430_v0  ;;  %v1457_v35 = vld [vmem:[%s2677_s1 + $0x390] sm:$0xff]  ;;  %v2120_v36 = vld [vmem:[%s2052_s23] sm:$0xff]  ;;  %v2123_v37 = vld [vmem:[%s2052_s23 + $0x28] sm:$0xff] }
  0x35   : > { %566 = vmatpush.msrb.mxu1 %v1448_v1  ;;  %589 = vmatpush.msrb.mxu3 %v1464_v6  ;;  %v1421_v38 = vld [vmem:[%s2677_s1 + $0x280] sm:$0xff]  ;;  %v1456_v41 = vld [vmem:[%s2677_s1 + $0x388] sm:$0xff]  ;;  %v1420_v42 = vld [vmem:[%s2677_s1 + $0x278] sm:$0xff] }
  0x36   : > { %476 = vmatpush.msrb.mxu2 %v1413_v3  ;;  %499 = vmatpush.msrb.mxu0 %v1429_v4  ;;  %v1405_v39 = vld [vmem:[%s2677_s1 + $0x200] sm:$0xff]  ;;  %v1404_v43 = vld [vmem:[%s2677_s1 + $0x1f8] sm:$0xff]  ;;  %v1419_v46 = vld [vmem:[%s2677_s1 + $0x270] sm:$0xff] }
  0x37   : > { %567 = vmatpush.msrb.mxu1 %v1447_v5  ;;  %590 = vmatpush.msrb.mxu3 %v1463_v10  ;;  %v1439_v40 = vld [vmem:[%s2677_s1 + $0x300] sm:$0xff]  ;;  %v1438_v44 = vld [vmem:[%s2677_s1 + $0x2f8] sm:$0xff]  ;;  %v1403_v47 = vld [vmem:[%s2677_s1 + $0x1f0] sm:$0xff] }
  0x38   : > { %477 = vmatpush.msrb.mxu2 %v1412_v7  ;;  %500 = vmatpush.msrb.mxu0 %v1428_v8  ;;  %v1455_v45 = vld [vmem:[%s2677_s1 + $0x380] sm:$0xff]  ;;  %v1437_v48 = vld [vmem:[%s2677_s1 + $0x2f0] sm:$0xff]  ;;  %v1454_v49 = vld [vmem:[%s2677_s1 + $0x378] sm:$0xff] }
  0x39   : > { %568 = vmatpush.msrb.mxu1 %v1446_v9  ;;  %591 = vmatpush.msrb.mxu3 %v1462_v14  ;;  %v1418_v50 = vld [vmem:[%s2677_s1 + $0x268] sm:$0xff]  ;;  %v1453_v53 = vld [vmem:[%s2677_s1 + $0x370] sm:$0xff]  ;;  %v2177_v54 = vld [vmem:[%s2052_s23 + $0x18] sm:$0xff] }
  0x3a   : > { %478 = vmatpush.msrb.mxu2 %v1411_v11  ;;  %501 = vmatpush.msrb.mxu0 %v1427_v12  ;;  %v1402_v51 = vld [vmem:[%s2677_s1 + $0x1e8] sm:$0xff]  ;;  %v1477_v56 = vld [vmem:[%s2677_s1 + $0x430] sm:$0xff]  ;;  %v1435_v58 = vld [vmem:[%s2677_s1 + $0x2e0] sm:$0xff] }
  0x3b   : > { %569 = vmatpush.msrb.mxu1 %v1445_v13  ;;  %592 = vmatpush.msrb.mxu3 %v1461_v18  ;;  %v1436_v52 = vld [vmem:[%s2677_s1 + $0x2e8] sm:$0xff]  ;;  %v1495_v57 = vld [vmem:[%s2677_s1 + $0x4b0] sm:$0xff]  ;;  %v1451_v62 = vld [vmem:[%s2677_s1 + $0x360] sm:$0xff] }
  0x3c   : > { %479 = vmatpush.msrb.mxu2 %v1410_v15  ;;  %502 = vmatpush.msrb.mxu0 %v1426_v16  ;;  %v2180_v55 = vld [vmem:[%s2052_s23 + $0x8] sm:$0xff]  ;;  %v1434_v63 = vld [vmem:[%s2677_s1 + $0x2d8] sm:$0xff]  ;;  %v1475_v0 = vld [vmem:[%s2677_s1 + $0x420] sm:$0xff] }
  0x3d   : > { %570 = vmatpush.msrb.mxu1 %v1444_v17  ;;  %1384 = vmatmul.msk.f32.vlgmr.msra.gmra.mxu2 %vm327_vm0, %v2067_v19  ;;  %v1452_v59 = vld [vmem:[%s2677_s1 + $0x368] sm:$0xff]  ;;  %v1493_v1 = vld [vmem:[%s2677_s1 + $0x4a0] sm:$0xff]  ;;  %v1450_v2 = vld [vmem:[%s2677_s1 + $0x358] sm:$0xff] }
  0x3e   : > { %503 = vmatpush.msrb.mxu0 %v1425_v20  ;;  %480 = vmatpush.msrb.mxu2 %v1409_v21  ;;  %v1476_v60 = vld [vmem:[%s2677_s1 + $0x428] sm:$0xff]  ;;  %v1433_v3 = vld [vmem:[%s2677_s1 + $0x2d0] sm:$0xff]  ;;  %v1474_v4 = vld [vmem:[%s2677_s1 + $0x418] sm:$0xff] }
  0x3f   : > { %571 = vmatpush.msrb.mxu1 %v1443_v22  ;;  %593 = vmatpush.msrb.mxu3 %v1460_v23  ;;  %v1494_v61 = vld [vmem:[%s2677_s1 + $0x4a8] sm:$0xff]  ;;  %v1492_v5 = vld [vmem:[%s2677_s1 + $0x498] sm:$0xff]  ;;  %v1511_v6 = vld [vmem:[%s2677_s1 + $0x530] sm:$0xff] }
  0x40   : > { %504 = vmatpush.msrb.mxu0 %v1424_v24  ;;  %481 = vmatpush.msrb.mxu2 %v1408_v25  ;;  %v2232_v7 = vld [vmem:[%s2052_s23 + $0x20] sm:$0xff]  ;;  %v1449_v8 = vld [vmem:[%s2677_s1 + $0x350] sm:$0xff]  ;;  %v1510_v11 = vld [vmem:[%s2677_s1 + $0x528] sm:$0xff]  ;;  %s269_s23 = sand.u32 1, %s1707_s25  }
  0x41   : > { %572 = vmatpush.msrb.mxu1 %v1442_v26  ;;  %594 = vmatpush.msrb.mxu3 %v1459_v27  ;;  %v1473_v9 = vld [vmem:[%s2677_s1 + $0x410] sm:$0xff]  ;;  %v1524_v12 = vld [vmem:[%s2677_s1 + $0x598] sm:$0xff]  ;;  %v1472_v13 = vld [vmem:[%s2677_s1 + $0x408] sm:$0xff]  ;;  %s270_s17 = scalar_lea.vmem [#allocation2], %s269_s23  ;;  %s1312_s20 = scalar_lea.sflag [#allocation3], %s269_s23 }
  0x42   : > { %505 = vmatpush.msrb.mxu0 %v1423_v28  ;;  %482 = vmatpush.msrb.mxu2 %v1407_v29  ;;  %v1491_v10 = vld [vmem:[%s2677_s1 + $0x490] sm:$0xff]  ;;  %v1490_v14 = vld [vmem:[%s2677_s1 + $0x488] sm:$0xff]  ;;  %v1509_v15 = vld [vmem:[%s2677_s1 + $0x520] sm:$0xff]  ;;  %s1322_s18 = sshll.u32 %s270_s17, 4  ;;  %s1323_s18 = int_to_ptr.vmem [resolvable:$true] %s1322_s18 }
  0x43   : > { %573 = vmatpush.msrb.mxu1 %v1441_v30  ;;  %595 = vmatpush.msrb.mxu3 %v1458_v31  ;;  %v1523_v16 = vld [vmem:[%s2677_s1 + $0x590] sm:$0xff]  ;;  %v1471_v17 = vld [vmem:[%s2677_s1 + $0x400] sm:$0xff]  ;;  %v1508_v20 = vld [vmem:[%s2677_s1 + $0x518] sm:$0xff] }
  0x44   : > { %506 = vmatpush.msrb.mxu0 %v1422_v32  ;;  %483 = vmatpush.msrb.mxu2 %v1406_v33  ;;  %v1489_v18 = vld [vmem:[%s2677_s1 + $0x480] sm:$0xff]  ;;  %v1522_v21 = vld [vmem:[%s2677_s1 + $0x588] sm:$0xff]  ;;  %v1470_v22 = vld [vmem:[%s2677_s1 + $0x3f8] sm:$0xff] }
  0x45   : > { %574 = vmatpush.msrb.mxu1 %v1440_v34  ;;  %596 = vmatpush.msrb.mxu3 %v1457_v35  ;;  %v1488_v23 = vld [vmem:[%s2677_s1 + $0x478] sm:$0xff]  ;;  %v1507_v24 = vld [vmem:[%s2677_s1 + $0x510] sm:$0xff]  ;;  %v1521_v25 = vld [vmem:[%s2677_s1 + $0x580] sm:$0xff] }
  0x46   : > { %350 = vmatmul.f32.vlgmr.msra.gmra.mxu0 %v2120_v36  ;;  %1385 = vmatmul.msk.f32.gmra.mxu2 %vm327_vm0, %v2123_v37  ;;  %v1469_v26 = vld [vmem:[%s2677_s1 + $0x3f0] sm:$0xff]  ;;  %v1506_v28 = vld [vmem:[%s2677_s1 + $0x508] sm:$0xff]  ;;  %v1520_v29 = vld [vmem:[%s2677_s1 + $0x578] sm:$0xff] }
  0x47   : > { %507 = vmatpush.msrb.mxu0 %v1421_v38  ;;  %484 = vmatpush.msrb.mxu2 %v1405_v39  ;;  %v1487_v27 = vld [vmem:[%s2677_s1 + $0x470] sm:$0xff]  ;;  %v1468_v30 = vld [vmem:[%s2677_s1 + $0x3e8] sm:$0xff]  ;;  %v1505_v32 = vld [vmem:[%s2677_s1 + $0x500] sm:$0xff] }
  0x48   : > { %575 = vmatpush.msrb.mxu1 %v1439_v40  ;;  %597 = vmatpush.msrb.mxu3 %v1456_v41  ;;  %v1486_v31 = vld [vmem:[%s2677_s1 + $0x468] sm:$0xff]  ;;  %v1519_v33 = vld [vmem:[%s2677_s1 + $0x570] sm:$0xff]  ;;  %v1467_v34 = vld [vmem:[%s2677_s1 + $0x3e0] sm:$0xff] }
  0x49   : > { %508 = vmatpush.msrb.mxu0 %v1420_v42  ;;  %485 = vmatpush.msrb.mxu2 %v1404_v43  ;;  %v1485_v35 = vld [vmem:[%s2677_s1 + $0x460] sm:$0xff]  ;;  %v1504_v38 = vld [vmem:[%s2677_s1 + $0x4f8] sm:$0xff]  ;;  %v1518_v39 = vld [vmem:[%s2677_s1 + $0x568] sm:$0xff] }
  0x4a   : > { %576 = vmatpush.msrb.mxu1 %v1438_v44  ;;  %598 = vmatpush.msrb.mxu3 %v1455_v45  ;;  %v1466_v40 = vld [vmem:[%s2677_s1 + $0x3d8] sm:$0xff]  ;;  %v1503_v42 = vld [vmem:[%s2677_s1 + $0x4f0] sm:$0xff]  ;;  %v1517_v43 = vld [vmem:[%s2677_s1 + $0x560] sm:$0xff] }
  0x4b   : > { %509 = vmatpush.msrb.mxu0 %v1419_v46  ;;  %486 = vmatpush.msrb.mxu2 %v1403_v47  ;;  %v1484_v41 = vld [vmem:[%s2677_s1 + $0x458] sm:$0xff]  ;;  %v1465_v44 = vld [vmem:[%s2677_s1 + $0x3d0] sm:$0xff]  ;;  %v1502_v46 = vld [vmem:[%s2677_s1 + $0x4e8] sm:$0xff] }
  0x4c   : > { %577 = vmatpush.msrb.mxu1 %v1437_v48  ;;  %599 = vmatpush.msrb.mxu3 %v1454_v49  ;;  %v1483_v45 = vld [vmem:[%s2677_s1 + $0x450] sm:$0xff]  ;;  %v1516_v47 = vld [vmem:[%s2677_s1 + $0x558] sm:$0xff]  ;;  %v1482_v48 = vld [vmem:[%s2677_s1 + $0x448] sm:$0xff] }
  0x4d   : > { %510 = vmatpush.msrb.mxu0 %v1418_v50  ;;  %465 = vmatmul.f32.vlgmr.msra.gmra.mxu3 %v2120_v36  ;;  %v1501_v49 = vld [vmem:[%s2677_s1 + $0x4e0] sm:$0xff]  ;;  %v1515_v50 = vld [vmem:[%s2677_s1 + $0x550] sm:$0xff] }
  0x4e   : > { %487 = vmatpush.msrb.mxu2 %v1402_v51  ;;  %578 = vmatpush.msrb.mxu1 %v1436_v52  ;;  %v1481_v51 = vld [vmem:[%s2677_s1 + $0x440] sm:$0xff]  ;;  %v1500_v52 = vld [vmem:[%s2677_s1 + $0x4d8] sm:$0xff] }
  0x4f   : > { %600 = vmatpush.msrb.mxu3 %v1453_v53  ;;  %353 = vmatmul.f32.gmra.mxu0 %v2177_v54  ;;  %v1514_v53 = vld [vmem:[%s2677_s1 + $0x548] sm:$0xff] }
  0x50   : > { %488 = vmatmul.f32.vlgmr.msrb.gmra.mxu2 %v2180_v55  ;;  %615 = vmatpush.msra.mxu0 %v1477_v56  ;;  %v1480_v56 = vld [vmem:[%s2677_s1 + $0x438] sm:$0xff] }
  0x51   : > { %683 = vmatpush.msra.mxu2 %v1495_v57  ;;  %579 = vmatpush.msrb.mxu1 %v1435_v58  ;;  %v1499_v57 = vld [vmem:[%s2677_s1 + $0x4d0] sm:$0xff]  ;;  %v1513_v58 = vld [vmem:[%s2677_s1 + $0x540] sm:$0xff] }
  0x52   : > { %601 = vmatpush.msrb.mxu3 %v1452_v59  ;;  %616 = vmatpush.msra.mxu0 %v1476_v60  ;;  %v1498_v59 = vld [vmem:[%s2677_s1 + $0x4c8] sm:$0xff]  ;;  %v1512_v60 = vld [vmem:[%s2677_s1 + $0x538] sm:$0xff] }
  0x53   : > { %684 = vmatpush.msra.mxu2 %v1494_v61  ;;  %373 = vmatmul.f32.vlgmr.msra.gmra.mxu1 %v2180_v55  ;;  %v1497_v61 = vld [vmem:[%s2677_s1 + $0x4c0] sm:$0xff] }
  0x54   : > { %602 = vmatpush.msrb.mxu3 %v1451_v62  ;;  %580 = vmatpush.msrb.mxu1 %v1434_v63  ;;  %v1496_v62 = vld [vmem:[%s2677_s1 + $0x4b8] sm:$0xff]  ;;  %v764_v63 = vld [vmem:[%s2679_s3 + $0x10] sm:$0xf] }
  0x55   : > { %617 = vmatpush.msra.mxu0 %v1475_v0  ;;  %685 = vmatpush.msra.mxu2 %v1493_v1 }
  0x56   : > { %603 = vmatpush.msrb.mxu3 %v1450_v2  ;;  %581 = vmatpush.msrb.mxu1 %v1433_v3 }
  0x57   : > { %618 = vmatpush.msra.mxu0 %v1474_v4  ;;  %686 = vmatpush.msra.mxu2 %v1492_v5  ;;  %v1529_v5 = vld [vmem:[%s2679_s3 + $0x28] sm:$0xf] }
  0x58   : > { %706 = vmatpush.msra.mxu1 %v1511_v6  ;;  %468 = vmatmul.f32.gmra.mxu3 %v2177_v54  ;;  %v1536_v6 = vld [vmem:[%s2679_s3 + $0x40] sm:$0xf] }
  0x59   : > { %491 = vmatmul.f32.gmra.mxu2 %v2232_v7  ;;  %604 = vmatpush.msrb.mxu3 %v1449_v8  ;;  %v1528_v8 = vld [vmem:[%s2679_s3 + $0x20] sm:$0xff] }
  0x5a   : > { %1431 = vmatmul.msk.f32.vlgmr.msrb.gmra.mxu0 %vm327_vm0, %v2067_v19  ;;  %687 = vmatpush.msra.mxu2 %v1491_v10  ;;  %v1527_v10 = vld [vmem:[%s2679_s3 + $0x18] sm:$0xff] }
  0x5b   : > { %619 = vmatpush.msra.mxu0 %v1473_v9  ;;  %707 = vmatpush.msra.mxu1 %v1510_v11  ;;  %v1535_v9 = vld [vmem:[%s2679_s3 + $0x38] sm:$0xff]  ;;  %v1534_v11 = vld [vmem:[%s2679_s3 + $0x30] sm:$0xff] }
  0x5c   : > { %732 = vmatpush.msra.mxu3 %v1524_v12  ;;  %688 = vmatpush.msra.mxu2 %v1490_v14  ;;  %v1566_v14 = vld [vmem:[%s2679_s3 + $0xd0] sm:$0xf] }
  0x5d   : > { %620 = vmatpush.msra.mxu0 %v1472_v13  ;;  %708 = vmatpush.msra.mxu1 %v1509_v15  ;;  %v1546_v13 = vld [vmem:[%s2679_s3 + $0x70] sm:$0xf] }
  0x5e   : > { %733 = vmatpush.msra.mxu3 %v1523_v16  ;;  %376 = vmatmul.f32.gmra.mxu1 %v2232_v7  ;;  %v1545_v16 = vld [vmem:[%s2679_s3 + $0x68] sm:$0xff] }
  0x5f   : > { %621 = vmatpush.msra.mxu0 %v1471_v17  ;;  %689 = vmatpush.msra.mxu2 %v1489_v18  ;;  %v1541_v17 = vld [vmem:[%s2679_s3 + $0x58] sm:$0xf]  ;;  %v1556_v18 = vld [vmem:[%s2679_s3 + $0xa0] sm:$0xf] }
  0x60   : > { %709 = vmatpush.msra.mxu1 %v1508_v20  ;;  %734 = vmatpush.msra.mxu3 %v1522_v21 }
  0x61   : > { %622 = vmatpush.msra.mxu0 %v1470_v22  ;;  %690 = vmatpush.msra.mxu2 %v1488_v23  ;;  %v1565_v22 = vld [vmem:[%s2679_s3 + $0xc8] sm:$0xff]  ;;  %v1544_v23 = vld [vmem:[%s2679_s3 + $0x60] sm:$0xff] }
  0x62   : > { %710 = vmatpush.msra.mxu1 %v1507_v24  ;;  %735 = vmatpush.msra.mxu3 %v1521_v25  ;;  %v1540_v24 = vld [vmem:[%s2679_s3 + $0x50] sm:$0xff]  ;;  %v1555_v25 = vld [vmem:[%s2679_s3 + $0x98] sm:$0xff] }
  0x63   : > { %1432 = vmatmul.msk.f32.gmra.mxu0 %vm327_vm0, %v2123_v37  ;;  %605 = vmatmul.f32.vlgmr.msrb.gmra.mxu3 %v2180_v55 }
  0x64   : > { %623 = vmatpush.msra.mxu0 %v1469_v26  ;;  %691 = vmatpush.msra.mxu2 %v1487_v27  ;;  %v1564_v26 = vld [vmem:[%s2679_s3 + $0xc0] sm:$0xff]  ;;  %v1539_v27 = vld [vmem:[%s2679_s3 + $0x48] sm:$0xff] }
  0x65   : > { %711 = vmatpush.msra.mxu1 %v1506_v28  ;;  %736 = vmatpush.msra.mxu3 %v1520_v29  ;;  %v1554_v28 = vld [vmem:[%s2679_s3 + $0x90] sm:$0xff] }
  0x66   : > { %624 = vmatpush.msra.mxu0 %v1468_v30  ;;  %692 = vmatpush.msra.mxu2 %v1486_v31  ;;  %v1586_v29 = vld [vmem:[%s2679_s3 + $0x130] sm:$0xf]  ;;  %v1585_v30 = vld [vmem:[%s2679_s3 + $0x128] sm:$0xff] }
  0x67   : > { %712 = vmatpush.msra.mxu1 %v1505_v32  ;;  %737 = vmatpush.msra.mxu3 %v1519_v33  ;;  %v1584_v33 = vld [vmem:[%s2679_s3 + $0x120] sm:$0xff] }
  0x68   : > { %625 = vmatpush.msra.mxu0 %v1467_v34  ;;  %693 = vmatpush.msra.mxu2 %v1485_v35 }
  0x69   : > { %713 = vmatpush.msra.mxu1 %v1504_v38  ;;  %738 = vmatpush.msra.mxu3 %v1518_v39 }
  0x6a   : > { %582 = vmatmul.f32.vlgmr.msrb.gmra.mxu1 %v2120_v36  ;;  %626 = vmatpush.msra.mxu0 %v1466_v40 }
  0x6b   : > { %694 = vmatpush.msra.mxu2 %v1484_v41  ;;  %714 = vmatpush.msra.mxu1 %v1503_v42 }
  0x6c   : > { %739 = vmatpush.msra.mxu3 %v1517_v43  ;;  %627 = vmatpush.msra.mxu0 %v1465_v44 }
  0x6d   : > { %608 = vmatmul.f32.gmra.mxu3 %v2232_v7  ;;  %695 = vmatpush.msra.mxu2 %v1483_v45 }
  0x6e   : > { %715 = vmatpush.msra.mxu1 %v1502_v46  ;;  %740 = vmatpush.msra.mxu3 %v1516_v47 }
  0x6f   : > { %1478 = vmatmul.msk.f32.vlgmr.msra.gmra.mxu0 %vm327_vm0, %v2067_v19  ;;  %696 = vmatpush.msra.mxu2 %v1482_v48 }
  0x70   : > { %716 = vmatpush.msra.mxu1 %v1501_v49  ;;  %741 = vmatpush.msra.mxu3 %v1515_v50 }
  0x71   : > { %697 = vmatpush.msra.mxu2 %v1481_v51  ;;  %1530 = vmatpush.msk.msrb.mxu0 %vm774_vm1, %v1529_v5  ;;  %v1550_v5 = vld [vmem:[%s2679_s3 + $0x80] sm:$0xff] }
  0x72   : > { %717 = vmatpush.msra.mxu1 %v1500_v52  ;;  %742 = vmatpush.msra.mxu3 %v1514_v53  ;;  %v1648_v53 = vld [vmem:[%s2678_s2] ss:$0 sm:$0xff] }
  0x73   : > { %585 = vmatmul.f32.gmra.mxu1 %v2177_v54  ;;  %698 = vmatpush.msra.mxu2 %v1480_v56 }
  0x74   : > { %718 = vmatpush.msra.mxu1 %v1499_v57  ;;  %743 = vmatpush.msra.mxu3 %v1513_v58 }
  0x75   : > { %699 = vmatmul.f32.vlgmr.msra.gmra.mxu2 %v2120_v36  ;;  %792 = vmatpush.msrb.mxu0 %v1528_v8 }
  0x76   : > { %719 = vmatpush.msra.mxu1 %v1498_v59  ;;  %744 = vmatpush.msra.mxu3 %v1512_v60 }
  0x77   : > { %1479 = vmatmul.msk.f32.gmra.mxu0 %vm327_vm0, %v2123_v37  ;;  %1525 = vmatmul.msk.f32.vlgmr.msra.gmra.mxu3 %vm327_vm0, %v2067_v19 }
  0x78   : > { %720 = vmatpush.msra.mxu1 %v1497_v61  ;;  %1532 = vmatpush.msk.msrb.mxu2 %vm774_vm1, %v764_v63 }
  0x79   : > { %1537 = vmatpush.msk.msrb.mxu3 %vm774_vm1, %v1536_v6  ;;  %793 = vmatpush.msrb.mxu0 %v1527_v10  ;;  %v1561_v6 = vld [vmem:[%s2679_s3 + $0xb8] sm:$0xf]  ;;  %v1560_v10 = vld [vmem:[%s2679_s3 + $0xb0] sm:$0xff] }
  0x7a   : > { %721 = vmatpush.msra.mxu1 %v1496_v62 }
  0x7b   : > { %722 = vmatmul.f32.vlgmr.msra.gmra.mxu1 %v2180_v55  ;;  %847 = vmatpush.msrb.mxu3 %v1535_v9  ;;  %v1549_v9 = vld [vmem:[%s2679_s3 + $0x78] sm:$0xff] }
  0x7c   : > { %1567 = vmatpush.msk.msrb.mxu1 %vm774_vm1, %v1566_v14  ;;  %1542 = vmatpush.msk.msra.mxu0 %vm774_vm1, %v1541_v17  ;;  %v1574_v17 = vld [vmem:[%s2679_s3 + $0xf0] sm:$0xff] }
  0x7d   : > { %702 = vmatmul.f32.gmra.mxu2 %v2177_v54  ;;  %848 = vmatpush.msrb.mxu3 %v1534_v11  ;;  %v1575_v11 = vld [vmem:[%s2679_s3 + $0xf8] sm:$0xff] }
  0x7e   : > { %1033 = vmatpush.msrb.mxu1 %v1565_v22  ;;  %878 = vmatpush.msra.mxu0 %v1540_v24  ;;  %v1581_v22 = vld [vmem:[%s2679_s3 + $0x118] sm:$0xf] }
  0x7f   : > { %1526 = vmatmul.msk.f32.gmra.mxu3 %vm327_vm0, %v2123_v37  ;;  %v763_v37 = vld [vmem:[%s2679_s3 + $0x8] sm:$0xff]  ;;  %v1569_v24 = vld [vmem:[%s2679_s3 + $0xd8] sm:$0xff] }
  0x80   : > { %817 = vmatpush.msrb.mxu2 %v763_v37  ;;  %1557 = vmatpush.msk.msra.mxu3 %vm774_vm1, %v1556_v18 }
  0x81   : > { %1034 = vmatpush.msrb.mxu1 %v1564_v26  ;;  %879 = vmatpush.msra.mxu0 %v1539_v27  ;;  %v1595_v26 = vld [vmem:[%s2679_s3 + $0x158] sm:$0xff]  ;;  %v1579_v27 = vld [vmem:[%s2679_s3 + $0x108] sm:$0xff] }
  0x82   : > { %971 = vmatpush.msra.mxu3 %v1555_v25  ;;  %v1580_v25 = vld [vmem:[%s2679_s3 + $0x110] sm:$0xff] }
  0x83   : > { %725 = vmatmul.f32.gmra.mxu1 %v2232_v7  ;;  %v762_v7 = vld [vmem:[%s2679_s3] sm:$0xff] }
  0x84   : > { %818 = vmatpush.msrb.mxu2 %v762_v7  ;;  %972 = vmatpush.msra.mxu3 %v1554_v28  ;;  %v1576_v7 = vld [vmem:[%s2679_s3 + $0x100] sm:$0xf] }
  0x85   : > { %1587 = vmatpush.msk.msra.mxu1 %vm774_vm1, %v1586_v29 }
  0x86   : > { %1547 = vmatpush.msk.msra.mxu2 %vm774_vm1, %v1546_v13  ;;  %v1559_v13 = vld [vmem:[%s2679_s3 + $0xa8] sm:$0xff] }
  0x87   : > { %1157 = vmatpush.msra.mxu1 %v1585_v30  ;;  %v1591_v30 = vld [vmem:[%s2679_s3 + $0x148] sm:$0xf] }
  0x88   : > { %909 = vmatpush.msra.mxu2 %v1545_v16  ;;  %v1571_v16 = vld [vmem:[%s2679_s3 + $0xe8] sm:$0xf] }
  0x89   : > { %1158 = vmatpush.msra.mxu1 %v1584_v33 }
  0x8a   : > { %910 = vmatpush.msra.mxu2 %v1544_v23  ;;  %v1596_v23 = vld [vmem:[%s2679_s3 + $0x160] sm:$0xf] }
  0xc0   : > { %v2412_v0 = vpop.f32.mrf.mxu2 }
  0xc3   : > { %v2407_v36 = vpop.f32.mrf.mxu0 }
  0xc9   : > { %v2420_v1 = vpop.f32.mrf.mxu2 }
  0xcc   : > { %v2415_v19 = vpop.f32.mrf.mxu0 }
  0xd0   : > { %v374_v55 = vpop.f32.mrf.mxu1  ;;  %v466_v54 = vpop.f32.mrf.mxu3 }
  0xd1   : > { %v375_v39 = vadd.f32 %v374_v55, %v2407_v36 }
  0xd3   : > { %v489_v12 = vpop.f32.mrf.mxu2  ;;  %v398_v42 = vadd.f32 %v2412_v0, %v375_v39  ;;  %v1600_v39 = vld [vmem:[%s2679_s3 + $0x170] sm:$0xff] }
  0xd4   : > { %v490_v34 = vadd.f32 %v489_v12, %v466_v54  ;;  %v1551_v54 = vld [vmem:[%s2679_s3 + $0x88] sm:$0xf] }
  0xd7   : > { %v512_v2 = vpop.f32.mrf.mxu0 }
  0xd8   : > { %v513_v40 = vadd.f32 %v512_v2, %v490_v34  ;;  %v1590_v34 = vld [vmem:[%s2679_s3 + $0x140] sm:$0xff] }
  0xda   : > { %v518_v47 = vmax.f32 %v398_v42, %v513_v40  ;;  %v1599_v40 = vld [vmem:[%s2679_s3 + $0x168] sm:$0xff] }
  0xdb   : > { %v2422_v3 = vpop.f32.mrf.mxu1  ;;  %v2424_v4 = vpop.f32.mrf.mxu3 }
  0xdc   : > { %v492_v31 = vpop.f32.mrf.mxu2  ;;  %v378_v50 = vadd.f32 %v2422_v3, %v2415_v19 }
  0xdd   : > { %v493_v48 = vadd.f32 %v492_v31, %v2424_v4  ;;  %v1594_v31 = vld [vmem:[%s2679_s3 + $0x150] sm:$0xff] }
  0xde   : > { %v401_v60 = vadd.f32 %v2420_v1, %v378_v50  ;;  %v1264_v50 = vld [vmem:[%s2681_s5 + $0x20] sm:$0xff] }
  0xe0   : > { %v515_v20 = vpop.f32.mrf.mxu0 }
  0xe1   : > { %v516_v57 = vadd.f32 %v515_v20, %v493_v48 }
  0xe3   : > { %v519_v55 = vmax.f32 %v401_v60, %v516_v57  ;;  %v1262_v57 = vld [vmem:[%s2681_s5 + $0x10] sm:$0xff] }
  0xe6   : > { %v606_v21 = vpop.f32.mrf.mxu3 }
  0xe7   : > { %v583_v15 = vpop.f32.mrf.mxu1 }
  0xe8   : > { %v607_v41 = vadd.f32 %v606_v21, %v583_v15  ;;  %v1570_v21 = vld [vmem:[%s2679_s3 + $0xe0] sm:$0xff] }
  0xec   : > { %v629_v35 = vpop.f32.mrf.mxu0 }
  0xed   : > { %v630_v43 = vadd.f32 %v629_v35, %v607_v41  ;;  %v1601_v35 = vld [vmem:[%s2679_s3 + $0x178] sm:$0xf] }
  0xef   : > { %v635_v51 = vmax.f32 %v518_v47, %v630_v43  ;;  %v1266_v47 = vld [vmem:[%s2681_s5 + $0x30] sm:$0x3] }
  0xf0   : > { %v586_v32 = vpop.f32.mrf.mxu1  ;;  %v609_v38 = vpop.f32.mrf.mxu3 }
  0xf1   : > { %v610_v58 = vadd.f32 %v609_v38, %v586_v32  ;;  %v1589_v38 = vld [vmem:[%s2679_s3 + $0x138] sm:$0xff] }
  0xf4   : > { %v632_v56 = vpop.f32.mrf.mxu0 }
  0xf5   : > { %v633_v61 = vadd.f32 %v632_v56, %v610_v58 }
  0xf7   : > { %v636_v2 = vmax.f32 %v519_v55, %v633_v61  ;;  %v1260_v61 = vld [vmem:[%s2681_s5] sm:$0xff] }
  0xf8   : > { %v700_v44 = vpop.f32.mrf.mxu2  ;;  %v723_v45 = vpop.f32.mrf.mxu1 }
  0xf9   : > { %v724_v46 = vadd.f32 %v723_v45, %v700_v44 }
  0xfa   : > { %v746_v49 = vpop.f32.mrf.mxu3 }
  0xfb   : > { %v747_v52 = vadd.f32 %v746_v49, %v724_v46  ;;  %v1265_v49 = vld [vmem:[%s2681_s5 + $0x28] sm:$0xff] }
  0xfd   : > { %v752_v59 = vmax.f32 %v635_v51, %v747_v52  ;;  %v1263_v52 = vld [vmem:[%s2681_s5 + $0x18] sm:$0xff] }
  0xff   : > { %v758_v62 = vadd.f32 %v1648_v53, %v752_v59  ;;  %v1261_v59 = vld [vmem:[%s2681_s5 + $0x8] sm:$0xff] }
 0x100   : > { %v703_v36 = vpop.f32.mrf.mxu2  ;;  %v726_v63 = vpop.f32.mrf.mxu1 }
 0x101   : > { %v727_v0 = vadd.f32 %v726_v63, %v703_v36  ;;  %v2508_v19 = vmax.f32 %v758_v62, 0.0 }
 0x102   : > { %v749_v37 = vpop.f32.mrf.mxu3 }
 0x103   : > { %v750_v3 = vadd.f32 %v749_v37, %v727_v0  ;;  %1533 = vmatmul.msk.f32.vlgmr.msrb.gmra.mxu2 %vm771_vm2, %v2508_v19  ;;  %v770_v1 = vrot.slane %v2508_v19, 1  ;;  %v827_v4 = vrot.slane %v2508_v19, 2  ;;  %v889_v15 = vrot.slane %v2508_v19, 4 }
 0x104   : > { %1552 = vmatpush.msk.msrb.mxu2 %vm774_vm1, %v1551_v54  ;;  %v858_v18 = vrot.slane %v2508_v19, 3  ;;  %v951_v20 = vrot.slane %v2508_v19, 6  ;;  %v920_v28 = vrot.slane %v2508_v19, 5  ;;  %v982_v32 = vrot.slane %v2508_v19, 7 }
 0x105   : > { %v753_v8 = vmax.f32 %v636_v2, %v750_v3  ;;  %1531 = vmatmul.msk.f32.vlgmr.msrb.gmra.mxu0 %vm771_vm2, %v770_v1  ;;  %1538 = vmatmul.msk.f32.vlgmr.msrb.gmra.mxu3 %vm771_vm2, %v827_v4 }
 0x106   : > { %940 = vmatpush.msrb.mxu2 %v1550_v5  ;;  %1562 = vmatpush.msk.msrb.mxu0 %vm774_vm1, %v1561_v6 }
 0x107   : > { %v759_v12 = vadd.f32 %v1648_v53, %v753_v8  ;;  %1577 = vmatpush.msk.msrb.mxu3 %vm774_vm1, %v1576_v7 }
 0x108   : > { %941 = vmatpush.msrb.mxu2 %v1549_v9  ;;  %1002 = vmatpush.msrb.mxu0 %v1560_v10 }
 0x109   : > { %v761_v14 = vmax.f32 %v759_v12, 0.0  ;;  %1095 = vmatpush.msrb.mxu3 %v1575_v11 }
 0x10a   : > { %1003 = vmatpush.msrb.mxu0 %v1559_v13 }
 0x10b   : > { %1548 = vmatmul.msk.f32.vlgmr.msra.gmra.mxu2 %vm771_vm2, %v889_v15  ;;  %1568 = vmatmul.msk.f32.vlgmr.msrb.gmra.mxu1 %vm771_vm2, %v761_v14  ;;  %v1137_v29 = vrot.slane %v761_v14, 4  ;;  %v1075_v33 = vrot.slane %v761_v14, 2  ;;  %v1044_v41 = vrot.slane %v761_v14, 1  ;;  %v1106_v42 = vrot.slane %v761_v14, 3 }
 0x10c   : > { %1572 = vmatpush.msk.msra.mxu2 %vm774_vm1, %v1571_v16  ;;  %1096 = vmatpush.msrb.mxu3 %v1574_v17  ;;  %v1199_v43 = vrot.slane %v761_v14, 6  ;;  %v1168_v44 = vrot.slane %v761_v14, 5  ;;  %v1230_v45 = vrot.slane %v761_v14, 7  ;;  %v1257_v16 = vld [vmem:[%s2680_s4] sm:$0x1] }
 0x10d   : > { %1543 = vmatmul.msk.f32.vlgmr.msra.gmra.mxu0 %vm771_vm2, %v858_v18  ;;  %1558 = vmatmul.msk.f32.vlgmr.msra.gmra.mxu3 %vm771_vm2, %v951_v20 }
 0x10e   : > { %1064 = vmatpush.msra.mxu2 %v1570_v21  ;;  %1582 = vmatpush.msk.msra.mxu0 %vm774_vm1, %v1581_v22  ;;  %v1267_v21 = vld [vmem:[%s2682_s6] sm:$0x1] }
 0x10f   : > { %1597 = vmatpush.msk.msra.mxu3 %vm774_vm1, %v1596_v23  ;;  %1604 = vmatpush.msk.msrb.mxu1 %vm1272_vm3, %v1266_v47 }
 0x110   : > { %1065 = vmatpush.msra.mxu2 %v1569_v24  ;;  %1126 = vmatpush.msra.mxu0 %v1580_v25 }
 0x111   : > { %1219 = vmatpush.msra.mxu3 %v1595_v26  ;;  %1286 = vmatpush.msrb.mxu1 %v1265_v49 }
 0x112   : > { %1127 = vmatpush.msra.mxu0 %v1579_v27 }
 0x113   : > { %1553 = vmatmul.msk.f32.vlgmr.msrb.gmra.mxu2 %vm771_vm2, %v920_v28  ;;  %1588 = vmatmul.msk.f32.vlgmr.msra.gmra.mxu1 %vm771_vm2, %v1137_v29 }
 0x114   : > { %1592 = vmatpush.msk.msrb.mxu2 %vm774_vm1, %v1591_v30  ;;  %1220 = vmatpush.msra.mxu3 %v1594_v31 }
 0x115   : > { %1563 = vmatmul.msk.f32.vlgmr.msrb.gmra.mxu0 %vm771_vm2, %v982_v32  ;;  %1578 = vmatmul.msk.f32.vlgmr.msrb.gmra.mxu3 %vm771_vm2, %v1075_v33 }
 0x116   : > { %1188 = vmatpush.msrb.mxu2 %v1590_v34  ;;  %1602 = vmatpush.msk.msrb.mxu0 %vm774_vm1, %v1601_v35 }
 0x117   : > { %1287 = vmatpush.msrb.mxu1 %v1264_v50 }
 0x118   : > { %1189 = vmatpush.msrb.mxu2 %v1589_v38  ;;  %1250 = vmatpush.msrb.mxu0 %v1600_v39 }
 0x119   : > { %1288 = vmatpush.msrb.mxu1 %v1263_v52 }
 0x11a   : > { %1251 = vmatpush.msrb.mxu0 %v1599_v40 }
 0x11b   : > { %1573 = vmatmul.msk.f32.vlgmr.msra.gmra.mxu2 %vm771_vm2, %v1044_v41  ;;  %1289 = vmatpush.msrb.mxu1 %v1262_v57 }
 0x11d   : > { %1583 = vmatmul.msk.f32.vlgmr.msra.gmra.mxu0 %vm771_vm2, %v1106_v42  ;;  %1598 = vmatmul.msk.f32.vlgmr.msra.gmra.mxu3 %vm771_vm2, %v1199_v43 }
 0x11e   : > { %1290 = vmatpush.msrb.mxu1 %v1261_v59 }
 0x120   : > { %1291 = vmatpush.msrb.mxu1 %v1260_v61 }
 0x123   : > { %1593 = vmatmul.msk.f32.vlgmr.msrb.gmra.mxu2 %vm771_vm2, %v1168_v44 }
 0x125   : > { %1603 = vmatmul.msk.f32.vlgmr.msrb.gmra.mxu0 %vm771_vm2, %v1230_v45 }
 0x182   : > { %v795_v46 = vpop.f32.mrf.mxu0 }
 0x186   : > { %v820_v48 = vpop.f32.mrf.mxu2 }
 0x187   : > { %v821_v53 = vadd.f32 %v820_v48, %v795_v46 }
 0x188   : > { %v850_v51 = vpop.f32.mrf.mxu3  ;;  %v1036_v37 = vpop.f32.mrf.mxu1 }
 0x189   : > { %v853_v60 = vadd.f32 %v850_v51, %v821_v53 }
 0x18a   : > { %v881_v56 = vpop.f32.mrf.mxu0 }
 0x18b   : > { %v884_v62 = vadd.f32 %v881_v56, %v853_v60 }
 0x18e   : > { %v912_v58 = vpop.f32.mrf.mxu2 }
 0x18f   : > { %v915_v63 = vadd.f32 %v912_v58, %v884_v62 }
 0x190   : > { %v974_v36 = vpop.f32.mrf.mxu3  ;;  %v1160_v9 = vpop.f32.mrf.mxu1 }
 0x192   : > { %v1005_v0 = vpop.f32.mrf.mxu0 }
 0x196   : > { %v943_v55 = vpop.f32.mrf.mxu2 }
 0x197   : > { %v946_v19 = vadd.f32 %v943_v55, %v915_v63 }
 0x198   : > { %v1098_v1 = vpop.f32.mrf.mxu3 }
 0x199   : > { %v977_v54 = vadd.f32 %v974_v36, %v946_v19 }
 0x19a   : > { %v1129_v6 = vpop.f32.mrf.mxu0 }
 0x19b   : > { %v1008_v2 = vadd.f32 %v1005_v0, %v977_v54 }
 0x19d   : > { %v1039_v3 = vadd.f32 %v1036_v37, %v1008_v2 }
 0x19e   : > { %v1067_v4 = vpop.f32.mrf.mxu2 }
 0x19f   : > { %v1070_v5 = vadd.f32 %v1067_v4, %v1039_v3 }
 0x1a0   : > { %v1222_v13 = vpop.f32.mrf.mxu3 }
 0x1a1   : > { %v1101_v7 = vadd.f32 %v1098_v1, %v1070_v5 }
 0x1a2   : > { %v1253_v15 = vpop.f32.mrf.mxu0 }
 0x1a3   : > { %v1132_v8 = vadd.f32 %v1129_v6, %v1101_v7 }
 0x1a5   : > { %v1163_v10 = vadd.f32 %v1160_v9, %v1132_v8 }
 0x1a6   : > { %v1191_v11 = vpop.f32.mrf.mxu2 }
 0x1a7   : > { %v1194_v12 = vadd.f32 %v1191_v11, %v1163_v10 }
 0x1a9   : > { %v1225_v14 = vadd.f32 %v1222_v13, %v1194_v12 }
 0x1ab   : > { %v1256_v17 = vadd.f32 %v1253_v15, %v1225_v14 }
 0x1ad   : > { %v1258_v18 = vadd.f32 %v1257_v16, %v1256_v17 }
 0x1af   : > { %v1259_v20 = vmax.f32 %v1258_v18, 0.0 }
 0x1b1   : > { %1605 = vmatmul.msk.f32.vlgmr.msrb.gmra.mxu1 %vm1268_vm4, %v1259_v20 }
 0x22e   : > { %v1293_v22 = vpop.f32.mrf.mxu1 }
 0x22f   : > { %v1294_v23 = vadd.f32 %v1293_v22, %v1267_v21 }
 0x231   : > { %v1297_v24 = vsel %vm1296_vm5, %v1294_v23, -inf }
 0x232   : > { %1298 = vmax.xlane.f32.xlu0 %v1297_v24 }
 0x2a5   : > { %v1299_v25 = vpop.xlane.xlu0 %1298 }
 0x2a6   : > { %v1300_v26 = vsub.f32 %v1294_v23, %v1299_v25 }
 0x2a8   : > { %v1301_v27 = vmul.f32 1.442695, %v1300_v26 }
 0x2aa   : > { %1649 = vpow2.f32 %v1301_v27 }
 0x2b0   : > { %v1650_v28 = vpop.eup %1649 }
 0x2b1   : > { %v1303_v29 = vsel %vm1296_vm5, %v1650_v28, 0.0 }
 0x2b2   : > { %1304 = vadd.xlane.f32.xlu0 %v1303_v29 }
 0x325   : > { %v1305_v30 = vpop.xlane.xlu0 %1304 }
 0x326   : > { %1651 = vlog2.f32 %v1305_v30 }
 0x32c   : > { %v1652_v31 = vpop.eup %1651 }
 0x32d   : > { %v1307_v32 = vmul.f32 0.6931472, %v1652_v31 }
 0x32f   : > { %v1308_v33 = vadd.f32 %v1307_v32, %v1299_v25 }
 0x331   : > { %v1309_v34 = vsub.f32 %v1294_v23, %v1308_v33 }
 0x333   : > { %1310 = vst.msk [vmem:[%s270_s17] sm:$0x1] %vm1296_vm5, %v1309_v34 }
 0x334   : > { %1680 = shalt.err (!%p1677_p3)
}
 0x335   : > { %1609 = dma.vmem_to_hbm [thread:$0]  (%p1795_p5), %s1323_s18, 16, %s1325_s19, %s1312_s20  }
 0x336 PF: > { %p1615_p4 = scmp.ge.s32.totalorder %s1715_s27, 2  ;;  %s1336_s23 = sand.u32 1, %s1703_s24  }
 0x337   : > { %s1337_s14 = scalar_lea.sflag [#allocation3], %s1336_s23 }
 0x338   : > { %p1612_p7 = pnand %p1615_p4, %p1799_p6 }
 0x33a   : > { %p1613_p8 = pneg %p1612_p7 }
 0x33c   : > { %1698 = dma.done.wait (%p1613_p8), %s1337_s14, 16  }
 0x33d   : > { %1700 = vsyncadd (%p1613_p8), %s1337_s14, 4294967280  ;;  %p17_p9 = scmp.ge.s32.totalorder %s1782_s30, 4   ;;  %s2686_s24 = smov %s1707_s25 }
 0x33e   : > { %s2687_s25 = smov %s1711_s26  ;;  %s2688_s26 = smov %s1793_s10 }
 0x33f   : > { %s2689_s27 = smov %s1782_s30  ;;  %19 = sbr.rel (!%p17_p9) target bundleno = 3 (0x3), region = 101 }
 0x344   :  { %1342 = vsyncpa [#allocation3], 1 }
 0x345   :  { %1344 = vsyncpa [#allocation3 + $0x1], 1 }

</bundles_post_ra>
